<compile_context>
chip_gen: v7x
topology: tpu7x:2x2x1
jax: 0.10.0
libtpu: 0.0.40
codegen_flags: <defaults>
</compile_context>

<pallas_src>
import functools
import math

import jax
import jax.numpy as jnp
from jax import lax
from jax.experimental import pallas as pl
from jax.experimental.pallas import tpu as pltpu


def _round_up(x, m):
    return (x + m - 1) // m * m


def _attention_kernel(xl_ref, xc_ref, xr_ref, wq_ref, wkv_ref, wo_ref, bo_ref,
                      o_ref, *, num_heads, window_size, halo, scale, q_block):
    H = num_heads
    W = window_size
    HP = halo
    _, TL, D = xc_ref.shape
    DH = D // H
    P = W // 2
    lo_off = -P                 # window covers offsets [-P, W-1-P] (as_strided)
    hi_off = W - 1 - P

    cdt = wq_ref.dtype          # compute (MXU operand) dtype: f32 or bf16

    # ---- halo assembly: rows [tile_start - HP, tile_end + HP) ----------------
    xc = xc_ref[0]                                               # (TL, D)
    x_halo = jnp.concatenate([xl_ref[0], xc, xr_ref[0]], axis=0)  # (TL+2HP, D)

    # ---- projections (MXU, f32 accumulate) -----------------------------------
    # Q only over the TL centre rows; K/V over the halo rows.
    q = jnp.dot(xc, wq_ref[...], preferred_element_type=jnp.float32) * scale
    kv = jnp.dot(x_halo, wkv_ref[...], preferred_element_type=jnp.float32)
    k = kv[:, :D]                                                # (TLH, D)
    v = kv[:, D:]                                                # (TLH, D)

    neg_big = jnp.float32(-1e30)     # scores are f32 even on the bf16 path
    QB = q_block

    # ---- band-blocked attention: query sub-blocks x heads --------------------
    ctx_rows = []
    for t0 in range(0, TL, QB):
        qb = min(QB, TL - t0)
        span = qb + 2 * HP          # key/value rows needed by this sub-block
        # Band mask is identical for every head (and every grid step).
        t = lax.broadcasted_iota(jnp.int32, (qb, span), 0)
        s = lax.broadcasted_iota(jnp.int32, (qb, span), 1)
        rel = (s - HP) - t
        in_win = (rel >= lo_off) & (rel <= hi_off)

        head_parts = []
        for h in range(H):
            c0 = h * DH
            qh = q[t0:t0 + qb, c0:c0 + DH]          # (qb, DH)
            kh = k[t0:t0 + span, c0:c0 + DH]        # (span, DH)
            vh = v[t0:t0 + span, c0:c0 + DH]        # (span, DH)

            sc = lax.dot_general(qh.astype(cdt), kh.astype(cdt),
                                 (((1,), (1,)), ((), ())),
                                 preferred_element_type=jnp.float32)  # (qb, span)
            sc = jnp.where(in_win, sc, neg_big)

            m = jnp.max(sc, axis=-1, keepdims=True)
            p = jnp.exp(sc - m)                     # masked entries -> exactly 0
            denom = jnp.sum(p, axis=-1, keepdims=True)
            inv = pl.reciprocal(denom, approx=True)     # EUP slot
            inv = inv * (2.0 - denom * inv)             # Newton step -> ~f32

            ctx = jnp.dot(p.astype(cdt), vh.astype(cdt),
                          preferred_element_type=jnp.float32)         # (qb, DH)
            head_parts.append(ctx * inv)

        ctx_rows.append(head_parts[0] if H == 1
                        else jnp.concatenate(head_parts, axis=-1))    # (qb, D)

    ctx_all = ctx_rows[0] if len(ctx_rows) == 1 \
        else jnp.concatenate(ctx_rows, axis=0)                        # (TL, D)

    # ---- output projection + bias --------------------------------------------
    out = jnp.dot(ctx_all.astype(cdt), wo_ref[...],
                  preferred_element_type=jnp.float32)
    out = out + bo_ref[...].astype(jnp.float32)                       # (1,D) bcast
    o_ref[0] = out.astype(o_ref.dtype)


def sliding_self_attention(x, wq, wk, wv, wo, bo, *, num_heads, window_size,
                           seq_tile=256, softmax_block=128,
                           compute_dtype=jnp.float32, vmem_limit_bytes=None):
    """x: (B, L, D); wq/wk/wv/wo: (D, D) in (in, out) layout; bo: (D,)."""
    B, L, D = x.shape
    H = num_heads
    W = window_size
    assert D % H == 0, "embed_dim must be divisible by num_heads"
    DH = D // H
    P = W // 2
    scale = 1.0 / math.sqrt(DH)
    cdt = jnp.dtype(compute_dtype)

    # Halo rounded up to a sublane multiple; the query tile must be a multiple
    # of the halo so the HP-sized neighbour blocks index cleanly.
    HP = max(8, _round_up(max(P, 1), 8))
    TL = seq_tile if L > seq_tile else _round_up(L, 8)
    TL = _round_up(max(TL, HP), HP)
    L_pad = _round_up(L, TL)
    nq = L_pad // TL
    nhp = TL // HP

    # Query sub-block size for the band-blocked softmax (multiple of 8, <= TL).
    QB = min(TL, _round_up(max(min(softmax_block, TL), 8), 8))

    # Left pad must be a multiple of TL so the centre blocks stay TL-aligned
    # while the HP halo blocks read real zero rows at the edges (zero rows
    # project to zero K/V because the projections have no bias — this is
    # exactly the module's zero padding).  Tail-pad queries are sliced off.
    x_in = x.astype(cdt) if cdt != x.dtype else x
    x_work = jnp.pad(x_in, ((0, 0), (TL, TL + (L_pad - L)), (0, 0)))

    wq_c = wq.astype(cdt)
    wkv = jnp.concatenate([wk, wv], axis=1).astype(cdt)   # (D, 2D) fused K/V
    wo_c = wo.astype(cdt)
    bo2 = bo.reshape(1, D).astype(jnp.float32)

    kernel = functools.partial(_attention_kernel, num_heads=H, window_size=W,
                               halo=HP, scale=scale, q_block=QB)

    def build(single_buffer_weights):
        wmode = {}
        if single_buffer_weights and hasattr(pl, "Buffered"):
            wmode = dict(pipeline_mode=pl.Buffered(1))
        grid_spec = pltpu.PrefetchScalarGridSpec(
            num_scalar_prefetch=0,
            grid=(B, nq),
            in_specs=[
                # left halo: original rows [qi*TL - HP, qi*TL)
                pl.BlockSpec((1, HP, D), lambda b, qi: (b, (qi + 1) * nhp - 1, 0)),
                # centre tile: original rows [qi*TL, (qi+1)*TL)
                pl.BlockSpec((1, TL, D), lambda b, qi: (b, qi + 1, 0)),
                # right halo: original rows [(qi+1)*TL, (qi+1)*TL + HP)
                pl.BlockSpec((1, HP, D), lambda b, qi: (b, (qi + 2) * nhp, 0)),
                pl.BlockSpec((D, D), lambda b, qi: (0, 0), **wmode),      # Wq
                pl.BlockSpec((D, 2 * D), lambda b, qi: (0, 0), **wmode),  # Wkv
                pl.BlockSpec((D, D), lambda b, qi: (0, 0), **wmode),      # Wo
                pl.BlockSpec((1, D), lambda b, qi: (0, 0), **wmode),      # bias
            ],
            out_specs=pl.BlockSpec((1, TL, D), lambda b, qi: (b, qi, 0)),
        )
        cp_kwargs = dict(dimension_semantics=("parallel", "parallel"))
        if vmem_limit_bytes is not None:
            cp_kwargs["vmem_limit_bytes"] = vmem_limit_bytes
        return pl.pallas_call(
            kernel,
            out_shape=jax.ShapeDtypeStruct((B, L_pad, D), x.dtype),
            grid_spec=grid_spec,
            compiler_params=pltpu.CompilerParams(**cp_kwargs),
        )

    args = (x_work, x_work, x_work, wq_c, wkv, wo_c, bo2)
    try:
        out = build(True)(*args)
    except Exception:
        # Fallback if single-buffered (Buffered(1)) blocks are unsupported on
        # this jax/backend version; identical semantics, default buffering.
        out = build(False)(*args)
    return out[:, :L]


def reference(x, wq, wk, wv, wo, bo, *, num_heads, window_size):
    """Pure-JAX re-implementation of the PyTorch forward for verification."""
    B, L, D = x.shape
    H, W = num_heads, window_size
    DH = D // H
    P = W // 2
    q = (x @ wq).reshape(B, L, H, 1, DH)
    xpad = jnp.pad(x, ((0, 0), (P, P), (0, 0)))
    k = xpad @ wk                                       # (B, L+2P, D)
    v = xpad @ wv
    kw = jnp.stack([k[:, j:j + L] for j in range(W)], axis=2)   # (B, L, W, D)
    vw = jnp.stack([v[:, j:j + L] for j in range(W)], axis=2)
    kw = kw.reshape(B, L, W, H, DH).transpose(0, 1, 3, 2, 4)    # (B, L, H, W, DH)
    vw = vw.reshape(B, L, W, H, DH).transpose(0, 1, 3, 2, 4)
    s = jnp.matmul(q, jnp.swapaxes(kw, -1, -2)) / math.sqrt(DH)  # (B, L, H, 1, W)
    p = jax.nn.softmax(s, axis=-1)
    out = jnp.matmul(p, vw).reshape(B, L, D)
    return out @ wo + bo


def _run_case(key, B, L, D, H, WIN, rtol=2e-4, atol=2e-4, **kernel_kwargs):
    kx, kq, kk, kv, ko, kb = jax.random.split(key, 6)
    x = jax.random.normal(kx, (B, L, D), dtype=jnp.float32)
    wq = jax.random.normal(kq, (D, D), dtype=jnp.float32) * (1.0 / math.sqrt(D))
    wk = jax.random.normal(kk, (D, D), dtype=jnp.float32) * (1.0 / math.sqrt(D))
    wv = jax.random.normal(kv, (D, D), dtype=jnp.float32) * (1.0 / math.sqrt(D))
    wo = jax.random.normal(ko, (D, D), dtype=jnp.float32) * (1.0 / math.sqrt(D))
    bo = jax.random.normal(kb, (D,), dtype=jnp.float32) * 0.1

    out = sliding_self_attention(x, wq, wk, wv, wo, bo,
                                 num_heads=H, window_size=WIN, **kernel_kwargs)
    out = jax.block_until_ready(out)
    ref = reference(x, wq, wk, wv, wo, bo, num_heads=H, window_size=WIN)
    assert out.shape == (B, L, D)
    err = jnp.max(jnp.abs(out - ref))
    assert jnp.allclose(out, ref, rtol=rtol, atol=atol), f"max abs err = {err}"


if __name__ == "__main__":
    key = jax.random.PRNGKey(0)
    k1, k2, k3 = jax.random.split(key, 3)
    # Small module-consistent shapes (odd window, single tile).
    _run_case(k1, B=2, L=16, D=32, H=4, WIN=5)
    # Multi-tile + ragged L + even window + band-blocked softmax with a ragged
    # final query sub-block: exercises halo blocks / tiling / sub-block paths.
    _run_case(k2, B=1, L=200, D=64, H=8, WIN=6, seq_tile=128, softmax_block=48)
    # bf16 MXU-operand path (f32 accumulation / softmax); loose sanity check.
    _run_case(k3, B=1, L=64, D=64, H=4, WIN=7, compute_dtype=jnp.bfloat16,
              rtol=2e-1, atol=2e-1)
    print("KERNEL_OK")
</pallas_src>

<mosaic_0001>
module attributes {stable_mosaic.version = 11 : i64} {
  func.func @_attention_kernel(%arg0: i32, %arg1: i32, %arg2: memref<1x8x32xf32, #tpu.memory_space<vmem>>, %arg3: memref<1x16x32xf32, #tpu.memory_space<vmem>>, %arg4: memref<1x8x32xf32, #tpu.memory_space<vmem>>, %arg5: memref<32x32xf32, #tpu.memory_space<vmem>>, %arg6: memref<32x64xf32, #tpu.memory_space<vmem>>, %arg7: memref<32x32xf32, #tpu.memory_space<vmem>>, %arg8: memref<1x32xf32, #tpu.memory_space<vmem>>, %arg9: memref<1x16x32xf32, #tpu.memory_space<vmem>>) attributes {dimension_semantics = [#tpu.dimension_semantics<parallel>, #tpu.dimension_semantics<parallel>], iteration_bounds = array<i64: 2, 1>, scalar_prefetch = 0 : i64, scratch_operands = 0 : i64, tpu.core_type = #tpu.core_type<tc>, window_params = [{transform_indices = @transform_0, window_bounds = array<i64: 1, 8, 32>}, {transform_indices = @transform_1, window_bounds = array<i64: 1, 16, 32>}, {transform_indices = @transform_2, window_bounds = array<i64: 1, 8, 32>}, {pipeline_mode = #tpu.pipeline_mode<synchronous>, transform_indices = @transform_3, window_bounds = array<i64: 32, 32>}, {pipeline_mode = #tpu.pipeline_mode<synchronous>, transform_indices = @transform_4, window_bounds = array<i64: 32, 64>}, {pipeline_mode = #tpu.pipeline_mode<synchronous>, transform_indices = @transform_5, window_bounds = array<i64: 32, 32>}, {pipeline_mode = #tpu.pipeline_mode<synchronous>, transform_indices = @transform_6, window_bounds = array<i64: 1, 32>}, {transform_indices = @transform_7, window_bounds = array<i64: 1, 16, 32>}]} {
    %c0 = arith.constant 0 : index
    %c0_0 = arith.constant 0 : index
    %c0_1 = arith.constant 0 : index
    %0 = vector.load %arg3[%c0, %c0_0, %c0_1] : memref<1x16x32xf32, #tpu.memory_space<vmem>>, vector<1x16x32xf32>
    %1 = vector.shape_cast %0 : vector<1x16x32xf32> to vector<16x32xf32>
    %c0_2 = arith.constant 0 : index
    %c0_3 = arith.constant 0 : index
    %c0_4 = arith.constant 0 : index
    %2 = vector.load %arg2[%c0_2, %c0_3, %c0_4] : memref<1x8x32xf32, #tpu.memory_space<vmem>>, vector<1x8x32xf32>
    %3 = vector.shape_cast %2 : vector<1x8x32xf32> to vector<8x32xf32>
    %c0_5 = arith.constant 0 : index
    %c0_6 = arith.constant 0 : index
    %c0_7 = arith.constant 0 : index
    %4 = vector.load %arg4[%c0_5, %c0_6, %c0_7] : memref<1x8x32xf32, #tpu.memory_space<vmem>>, vector<1x8x32xf32>
    %5 = vector.shape_cast %4 : vector<1x8x32xf32> to vector<8x32xf32>
    %6 = tpu.concatenate %3, %1, %5 in 0 : vector<8x32xf32>, vector<16x32xf32>, vector<8x32xf32> -> vector<32x32xf32>
    %c0_8 = arith.constant 0 : index
    %c0_9 = arith.constant 0 : index
    %7 = vector.load %arg5[%c0_8, %c0_9] : memref<32x32xf32, #tpu.memory_space<vmem>>, vector<32x32xf32>
    %cst = arith.constant dense<0.000000e+00> : vector<16x32xf32>
    %8 = tpu.matmul %1, %7, %cst {dimension_numbers = #tpu.dot_dimension_numbers<[1], [0], [0], [1], [0, 0, 1, 1], [], []>} : vector<16x32xf32>, vector<32x32xf32>, vector<16x32xf32> -> vector<16x32xf32>
    %cst_10 = arith.constant 0.353553385 : f32
    %9 = vector.broadcast %cst_10 : f32 to vector<16x32xf32>
    %10 = arith.mulf %8, %9 : vector<16x32xf32>
    %c0_11 = arith.constant 0 : index
    %c0_12 = arith.constant 0 : index
    %11 = vector.load %arg6[%c0_11, %c0_12] : memref<32x64xf32, #tpu.memory_space<vmem>>, vector<32x64xf32>
    %cst_13 = arith.constant dense<0.000000e+00> : vector<32x64xf32>
    %12 = tpu.matmul %6, %11, %cst_13 {dimension_numbers = #tpu.dot_dimension_numbers<[1], [0], [0], [1], [0, 0, 1, 1], [], []>} : vector<32x32xf32>, vector<32x64xf32>, vector<32x64xf32> -> vector<32x64xf32>
    %13 = vector.extract_strided_slice %12 {offsets = [0, 0], sizes = [32, 32], strides = [1, 1]} : vector<32x64xf32> to vector<32x32xf32>
    %14 = vector.extract_strided_slice %12 {offsets = [0, 32], sizes = [32, 32], strides = [1, 1]} : vector<32x64xf32> to vector<32x32xf32>
    %15 = tpu.iota {dimensions = array<i32: 0>} : vector<16x32xi32>
    %16 = tpu.iota {dimensions = array<i32: 1>} : vector<16x32xi32>
    %c8_i32 = arith.constant 8 : i32
    %17 = vector.broadcast %c8_i32 : i32 to vector<16x32xi32>
    %18 = arith.subi %16, %17 : vector<16x32xi32>
    %19 = arith.subi %18, %15 : vector<16x32xi32>
    %c-2_i32 = arith.constant -2 : i32
    %20 = vector.broadcast %c-2_i32 : i32 to vector<16x32xi32>
    %21 = arith.cmpi sge, %19, %20 : vector<16x32xi32>
    %c2_i32 = arith.constant 2 : i32
    %22 = vector.broadcast %c2_i32 : i32 to vector<16x32xi32>
    %23 = arith.cmpi sle, %19, %22 : vector<16x32xi32>
    %24 = arith.andi %21, %23 : vector<16x32xi1>
    %25 = vector.extract_strided_slice %10 {offsets = [0, 0], sizes = [16, 8], strides = [1, 1]} : vector<16x32xf32> to vector<16x8xf32>
    %26 = vector.extract_strided_slice %13 {offsets = [0, 0], sizes = [32, 8], strides = [1, 1]} : vector<32x32xf32> to vector<32x8xf32>
    %27 = vector.extract_strided_slice %14 {offsets = [0, 0], sizes = [32, 8], strides = [1, 1]} : vector<32x32xf32> to vector<32x8xf32>
    %cst_14 = arith.constant dense<0.000000e+00> : vector<16x32xf32>
    %28 = tpu.matmul %25, %26, %cst_14 {dimension_numbers = #tpu.dot_dimension_numbers<[1], [1], [0], [0], [0, 0, 1, 0], [], []>} : vector<16x8xf32>, vector<32x8xf32>, vector<16x32xf32> -> vector<16x32xf32>
    %cst_15 = arith.constant -1.000000e+30 : f32
    %29 = vector.broadcast %cst_15 : f32 to vector<16x32xf32>
    %30 = arith.select %24, %28, %29 : vector<16x32xi1>, vector<16x32xf32>
    %cst_16 = arith.constant dense<0xFF800000> : vector<16xf32>
    %31 = vector.multi_reduction <maximumf>, %30, %cst_16 [1] : vector<16x32xf32> to vector<16xf32>
    %32 = vector.shape_cast %31 : vector<16xf32> to vector<16x1xf32>
    %33 = vector.broadcast %32 : vector<16x1xf32> to vector<16x32xf32>
    %34 = arith.subf %30, %33 : vector<16x32xf32>
    %35 = math.exp %34 : vector<16x32xf32>
    %cst_17 = arith.constant dense<0.000000e+00> : vector<16xf32>
    %36 = vector.multi_reduction <add>, %35, %cst_17 [1] : vector<16x32xf32> to vector<16xf32>
    %37 = vector.shape_cast %36 : vector<16xf32> to vector<16x1xf32>
    %38 = tpu.reciprocal %37 {approx = true} : vector<16x1xf32> -> vector<16x1xf32>
    %39 = arith.mulf %37, %38 : vector<16x1xf32>
    %cst_18 = arith.constant 2.000000e+00 : f32
    %40 = vector.broadcast %cst_18 : f32 to vector<16x1xf32>
    %41 = arith.subf %40, %39 : vector<16x1xf32>
    %42 = arith.mulf %38, %41 : vector<16x1xf32>
    %cst_19 = arith.constant dense<0.000000e+00> : vector<16x8xf32>
    %43 = tpu.matmul %35, %27, %cst_19 {dimension_numbers = #tpu.dot_dimension_numbers<[1], [0], [0], [1], [0, 0, 1, 1], [], []>} : vector<16x32xf32>, vector<32x8xf32>, vector<16x8xf32> -> vector<16x8xf32>
    %44 = vector.broadcast %42 : vector<16x1xf32> to vector<16x8xf32>
    %45 = arith.mulf %43, %44 : vector<16x8xf32>
    %46 = vector.extract_strided_slice %10 {offsets = [0, 8], sizes = [16, 8], strides = [1, 1]} : vector<16x32xf32> to vector<16x8xf32>
    %47 = vector.extract_strided_slice %13 {offsets = [0, 8], sizes = [32, 8], strides = [1, 1]} : vector<32x32xf32> to vector<32x8xf32>
    %48 = vector.extract_strided_slice %14 {offsets = [0, 8], sizes = [32, 8], strides = [1, 1]} : vector<32x32xf32> to vector<32x8xf32>
    %cst_20 = arith.constant dense<0.000000e+00> : vector<16x32xf32>
    %49 = tpu.matmul %46, %47, %cst_20 {dimension_numbers = #tpu.dot_dimension_numbers<[1], [1], [0], [0], [0, 0, 1, 0], [], []>} : vector<16x8xf32>, vector<32x8xf32>, vector<16x32xf32> -> vector<16x32xf32>
    %cst_21 = arith.constant -1.000000e+30 : f32
    %50 = vector.broadcast %cst_21 : f32 to vector<16x32xf32>
    %51 = arith.select %24, %49, %50 : vector<16x32xi1>, vector<16x32xf32>
    %cst_22 = arith.constant dense<0xFF800000> : vector<16xf32>
    %52 = vector.multi_reduction <maximumf>, %51, %cst_22 [1] : vector<16x32xf32> to vector<16xf32>
    %53 = vector.shape_cast %52 : vector<16xf32> to vector<16x1xf32>
    %54 = vector.broadcast %53 : vector<16x1xf32> to vector<16x32xf32>
    %55 = arith.subf %51, %54 : vector<16x32xf32>
    %56 = math.exp %55 : vector<16x32xf32>
    %cst_23 = arith.constant dense<0.000000e+00> : vector<16xf32>
    %57 = vector.multi_reduction <add>, %56, %cst_23 [1] : vector<16x32xf32> to vector<16xf32>
    %58 = vector.shape_cast %57 : vector<16xf32> to vector<16x1xf32>
    %59 = tpu.reciprocal %58 {approx = true} : vector<16x1xf32> -> vector<16x1xf32>
    %60 = arith.mulf %58, %59 : vector<16x1xf32>
    %cst_24 = arith.constant 2.000000e+00 : f32
    %61 = vector.broadcast %cst_24 : f32 to vector<16x1xf32>
    %62 = arith.subf %61, %60 : vector<16x1xf32>
    %63 = arith.mulf %59, %62 : vector<16x1xf32>
    %cst_25 = arith.constant dense<0.000000e+00> : vector<16x8xf32>
    %64 = tpu.matmul %56, %48, %cst_25 {dimension_numbers = #tpu.dot_dimension_numbers<[1], [0], [0], [1], [0, 0, 1, 1], [], []>} : vector<16x32xf32>, vector<32x8xf32>, vector<16x8xf32> -> vector<16x8xf32>
    %65 = vector.broadcast %63 : vector<16x1xf32> to vector<16x8xf32>
    %66 = arith.mulf %64, %65 : vector<16x8xf32>
    %67 = vector.extract_strided_slice %10 {offsets = [0, 16], sizes = [16, 8], strides = [1, 1]} : vector<16x32xf32> to vector<16x8xf32>
    %68 = vector.extract_strided_slice %13 {offsets = [0, 16], sizes = [32, 8], strides = [1, 1]} : vector<32x32xf32> to vector<32x8xf32>
    %69 = vector.extract_strided_slice %14 {offsets = [0, 16], sizes = [32, 8], strides = [1, 1]} : vector<32x32xf32> to vector<32x8xf32>
    %cst_26 = arith.constant dense<0.000000e+00> : vector<16x32xf32>
    %70 = tpu.matmul %67, %68, %cst_26 {dimension_numbers = #tpu.dot_dimension_numbers<[1], [1], [0], [0], [0, 0, 1, 0], [], []>} : vector<16x8xf32>, vector<32x8xf32>, vector<16x32xf32> -> vector<16x32xf32>
    %cst_27 = arith.constant -1.000000e+30 : f32
    %71 = vector.broadcast %cst_27 : f32 to vector<16x32xf32>
    %72 = arith.select %24, %70, %71 : vector<16x32xi1>, vector<16x32xf32>
    %cst_28 = arith.constant dense<0xFF800000> : vector<16xf32>
    %73 = vector.multi_reduction <maximumf>, %72, %cst_28 [1] : vector<16x32xf32> to vector<16xf32>
    %74 = vector.shape_cast %73 : vector<16xf32> to vector<16x1xf32>
    %75 = vector.broadcast %74 : vector<16x1xf32> to vector<16x32xf32>
    %76 = arith.subf %72, %75 : vector<16x32xf32>
    %77 = math.exp %76 : vector<16x32xf32>
    %cst_29 = arith.constant dense<0.000000e+00> : vector<16xf32>
    %78 = vector.multi_reduction <add>, %77, %cst_29 [1] : vector<16x32xf32> to vector<16xf32>
    %79 = vector.shape_cast %78 : vector<16xf32> to vector<16x1xf32>
    %80 = tpu.reciprocal %79 {approx = true} : vector<16x1xf32> -> vector<16x1xf32>
    %81 = arith.mulf %79, %80 : vector<16x1xf32>
    %cst_30 = arith.constant 2.000000e+00 : f32
    %82 = vector.broadcast %cst_30 : f32 to vector<16x1xf32>
    %83 = arith.subf %82, %81 : vector<16x1xf32>
    %84 = arith.mulf %80, %83 : vector<16x1xf32>
    %cst_31 = arith.constant dense<0.000000e+00> : vector<16x8xf32>
    %85 = tpu.matmul %77, %69, %cst_31 {dimension_numbers = #tpu.dot_dimension_numbers<[1], [0], [0], [1], [0, 0, 1, 1], [], []>} : vector<16x32xf32>, vector<32x8xf32>, vector<16x8xf32> -> vector<16x8xf32>
    %86 = vector.broadcast %84 : vector<16x1xf32> to vector<16x8xf32>
    %87 = arith.mulf %85, %86 : vector<16x8xf32>
    %88 = vector.extract_strided_slice %10 {offsets = [0, 24], sizes = [16, 8], strides = [1, 1]} : vector<16x32xf32> to vector<16x8xf32>
    %89 = vector.extract_strided_slice %13 {offsets = [0, 24], sizes = [32, 8], strides = [1, 1]} : vector<32x32xf32> to vector<32x8xf32>
    %90 = vector.extract_strided_slice %14 {offsets = [0, 24], sizes = [32, 8], strides = [1, 1]} : vector<32x32xf32> to vector<32x8xf32>
    %cst_32 = arith.constant dense<0.000000e+00> : vector<16x32xf32>
    %91 = tpu.matmul %88, %89, %cst_32 {dimension_numbers = #tpu.dot_dimension_numbers<[1], [1], [0], [0], [0, 0, 1, 0], [], []>} : vector<16x8xf32>, vector<32x8xf32>, vector<16x32xf32> -> vector<16x32xf32>
    %cst_33 = arith.constant -1.000000e+30 : f32
    %92 = vector.broadcast %cst_33 : f32 to vector<16x32xf32>
    %93 = arith.select %24, %91, %92 : vector<16x32xi1>, vector<16x32xf32>
    %cst_34 = arith.constant dense<0xFF800000> : vector<16xf32>
    %94 = vector.multi_reduction <maximumf>, %93, %cst_34 [1] : vector<16x32xf32> to vector<16xf32>
    %95 = vector.shape_cast %94 : vector<16xf32> to vector<16x1xf32>
    %96 = vector.broadcast %95 : vector<16x1xf32> to vector<16x32xf32>
    %97 = arith.subf %93, %96 : vector<16x32xf32>
    %98 = math.exp %97 : vector<16x32xf32>
    %cst_35 = arith.constant dense<0.000000e+00> : vector<16xf32>
    %99 = vector.multi_reduction <add>, %98, %cst_35 [1] : vector<16x32xf32> to vector<16xf32>
    %100 = vector.shape_cast %99 : vector<16xf32> to vector<16x1xf32>
    %101 = tpu.reciprocal %100 {approx = true} : vector<16x1xf32> -> vector<16x1xf32>
    %102 = arith.mulf %100, %101 : vector<16x1xf32>
    %cst_36 = arith.constant 2.000000e+00 : f32
    %103 = vector.broadcast %cst_36 : f32 to vector<16x1xf32>
    %104 = arith.subf %103, %102 : vector<16x1xf32>
    %105 = arith.mulf %101, %104 : vector<16x1xf32>
    %cst_37 = arith.constant dense<0.000000e+00> : vector<16x8xf32>
    %106 = tpu.matmul %98, %90, %cst_37 {dimension_numbers = #tpu.dot_dimension_numbers<[1], [0], [0], [1], [0, 0, 1, 1], [], []>} : vector<16x32xf32>, vector<32x8xf32>, vector<16x8xf32> -> vector<16x8xf32>
    %107 = vector.broadcast %105 : vector<16x1xf32> to vector<16x8xf32>
    %108 = arith.mulf %106, %107 : vector<16x8xf32>
    %109 = tpu.concatenate %45, %66, %87, %108 in 1 : vector<16x8xf32>, vector<16x8xf32>, vector<16x8xf32>, vector<16x8xf32> -> vector<16x32xf32>
    %c0_38 = arith.constant 0 : index
    %c0_39 = arith.constant 0 : index
    %110 = vector.load %arg7[%c0_38, %c0_39] : memref<32x32xf32, #tpu.memory_space<vmem>>, vector<32x32xf32>
    %cst_40 = arith.constant dense<0.000000e+00> : vector<16x32xf32>
    %111 = tpu.matmul %109, %110, %cst_40 {dimension_numbers = #tpu.dot_dimension_numbers<[1], [0], [0], [1], [0, 0, 1, 1], [], []>} : vector<16x32xf32>, vector<32x32xf32>, vector<16x32xf32> -> vector<16x32xf32>
    %c0_41 = arith.constant 0 : index
    %c0_42 = arith.constant 0 : index
    %112 = vector.load %arg8[%c0_41, %c0_42] : memref<1x32xf32, #tpu.memory_space<vmem>>, vector<1x32xf32>
    %113 = vector.broadcast %112 : vector<1x32xf32> to vector<16x32xf32>
    %114 = arith.addf %111, %113 : vector<16x32xf32>
    %c0_43 = arith.constant 0 : index
    %c0_44 = arith.constant 0 : index
    %c0_45 = arith.constant 0 : index
    %115 = vector.load %arg9[%c0_43, %c0_44, %c0_45] : memref<1x16x32xf32, #tpu.memory_space<vmem>>, vector<1x16x32xf32>
    %116 = vector.shape_cast %115 : vector<1x16x32xf32> to vector<16x32xf32>
    %117 = vector.shape_cast %114 : vector<16x32xf32> to vector<1x16x32xf32>
    tpu.vector_store %arg9[%c0_43, %c0_44, %c0_45], %117 {strides = array<i32>} : memref<1x16x32xf32, #tpu.memory_space<vmem>>, vector<1x16x32xf32>,
    return
  }
  func.func @transform_0(%arg0: i32, %arg1: i32) -> (i32, i32, i32) {
    %c1_i32 = arith.constant 1 : i32
    %0 = arith.addi %arg1, %c1_i32 : i32
    %c2_i32 = arith.constant 2 : i32
    %1 = arith.muli %0, %c2_i32 : i32
    %c1_i32_0 = arith.constant 1 : i32
    %2 = arith.subi %1, %c1_i32_0 : i32
    %c0_i32 = arith.constant 0 : i32
    %c0_i32_1 = arith.constant 0 : i32
    return %arg0, %2, %c0_i32 : i32, i32, i32
  }
  func.func @transform_1(%arg0: i32, %arg1: i32) -> (i32, i32, i32) {
    %c1_i32 = arith.constant 1 : i32
    %0 = arith.addi %arg1, %c1_i32 : i32
    %c0_i32 = arith.constant 0 : i32
    %c0_i32_0 = arith.constant 0 : i32
    return %arg0, %0, %c0_i32 : i32, i32, i32
  }
  func.func @transform_2(%arg0: i32, %arg1: i32) -> (i32, i32, i32) {
    %c2_i32 = arith.constant 2 : i32
    %0 = arith.addi %arg1, %c2_i32 : i32
    %c2_i32_0 = arith.constant 2 : i32
    %1 = arith.muli %0, %c2_i32_0 : i32
    %c0_i32 = arith.constant 0 : i32
    %c0_i32_1 = arith.constant 0 : i32
    return %arg0, %1, %c0_i32 : i32, i32, i32
  }
  func.func @transform_3(%arg0: i32, %arg1: i32) -> (i32, i32) {
    %c0_i32 = arith.constant 0 : i32
    %c0_i32_0 = arith.constant 0 : i32
    %c0_i32_1 = arith.constant 0 : i32
    return %c0_i32, %c0_i32_0 : i32, i32
  }
  func.func @transform_4(%arg0: i32, %arg1: i32) -> (i32, i32) {
    %c0_i32 = arith.constant 0 : i32
    %c0_i32_0 = arith.constant 0 : i32
    %c0_i32_1 = arith.constant 0 : i32
    return %c0_i32, %c0_i32_0 : i32, i32
  }
  func.func @transform_5(%arg0: i32, %arg1: i32) -> (i32, i32) {
    %c0_i32 = arith.constant 0 : i32
    %c0_i32_0 = arith.constant 0 : i32
    %c0_i32_1 = arith.constant 0 : i32
    return %c0_i32, %c0_i32_0 : i32, i32
  }
  func.func @transform_6(%arg0: i32, %arg1: i32) -> (i32, i32) {
    %c0_i32 = arith.constant 0 : i32
    %c0_i32_0 = arith.constant 0 : i32
    %c0_i32_1 = arith.constant 0 : i32
    return %c0_i32, %c0_i32_0 : i32, i32
  }
  func.func @transform_7(%arg0: i32, %arg1: i32) -> (i32, i32, i32) {
    %c0_i32 = arith.constant 0 : i32
    %c0_i32_0 = arith.constant 0 : i32
    return %arg0, %arg1, %c0_i32 : i32, i32, i32
  }
}

module attributes {stable_mosaic.version = 11 : i64} {
  func.func @_attention_kernel(%arg0: i32, %arg1: i32, %arg2: memref<1x8x32xf32, #tpu.memory_space<vmem>>, %arg3: memref<1x16x32xf32, #tpu.memory_space<vmem>>, %arg4: memref<1x8x32xf32, #tpu.memory_space<vmem>>, %arg5: memref<32x32xf32, #tpu.memory_space<vmem>>, %arg6: memref<32x64xf32, #tpu.memory_space<vmem>>, %arg7: memref<32x32xf32, #tpu.memory_space<vmem>>, %arg8: memref<1x32xf32, #tpu.memory_space<vmem>>, %arg9: memref<1x16x32xf32, #tpu.memory_space<vmem>>) attributes {dimension_semantics = [#tpu.dimension_semantics<parallel>, #tpu.dimension_semantics<parallel>], iteration_bounds = array<i64: 2, 1>, scalar_prefetch = 0 : i64, scratch_operands = 0 : i64, tpu.core_type = #tpu.core_type<tc>, window_params = [{transform_indices = @transform_0, window_bounds = array<i64: 1, 8, 32>}, {transform_indices = @transform_1, window_bounds = array<i64: 1, 16, 32>}, {transform_indices = @transform_2, window_bounds = array<i64: 1, 8, 32>}, {pipeline_mode = #tpu.pipeline_mode<synchronous>, transform_indices = @transform_3, window_bounds = array<i64: 32, 32>}, {pipeline_mode = #tpu.pipeline_mode<synchronous>, transform_indices = @transform_4, window_bounds = array<i64: 32, 64>}, {pipeline_mode = #tpu.pipeline_mode<synchronous>, transform_indices = @transform_5, window_bounds = array<i64: 32, 32>}, {pipeline_mode = #tpu.pipeline_mode<synchronous>, transform_indices = @transform_6, window_bounds = array<i64: 1, 32>}, {transform_indices = @transform_7, window_bounds = array<i64: 1, 16, 32>}]} {
    %c0 = arith.constant 0 : index
    %c0_0 = arith.constant 0 : index
    %c0_1 = arith.constant 0 : index
    %0 = vector.load %arg3[%c0, %c0_0, %c0_1] : memref<1x16x32xf32, #tpu.memory_space<vmem>>, vector<1x16x32xf32>
    %1 = vector.shape_cast %0 : vector<1x16x32xf32> to vector<16x32xf32>
    %c0_2 = arith.constant 0 : index
    %c0_3 = arith.constant 0 : index
    %c0_4 = arith.constant 0 : index
    %2 = vector.load %arg2[%c0_2, %c0_3, %c0_4] : memref<1x8x32xf32, #tpu.memory_space<vmem>>, vector<1x8x32xf32>
    %3 = vector.shape_cast %2 : vector<1x8x32xf32> to vector<8x32xf32>
    %c0_5 = arith.constant 0 : index
    %c0_6 = arith.constant 0 : index
    %c0_7 = arith.constant 0 : index
    %4 = vector.load %arg4[%c0_5, %c0_6, %c0_7] : memref<1x8x32xf32, #tpu.memory_space<vmem>>, vector<1x8x32xf32>
    %5 = vector.shape_cast %4 : vector<1x8x32xf32> to vector<8x32xf32>
    %6 = tpu.concatenate %3, %1, %5 in 0 : vector<8x32xf32>, vector<16x32xf32>, vector<8x32xf32> -> vector<32x32xf32>
    %c0_8 = arith.constant 0 : index
    %c0_9 = arith.constant 0 : index
    %7 = vector.load %arg5[%c0_8, %c0_9] : memref<32x32xf32, #tpu.memory_space<vmem>>, vector<32x32xf32>
    %cst = arith.constant dense<0.000000e+00> : vector<16x32xf32>
    %8 = tpu.matmul %1, %7, %cst {dimension_numbers = #tpu.dot_dimension_numbers<[1], [0], [0], [1], [0, 0, 1, 1], [], []>} : vector<16x32xf32>, vector<32x32xf32>, vector<16x32xf32> -> vector<16x32xf32>
    %cst_10 = arith.constant 0.353553385 : f32
    %9 = vector.broadcast %cst_10 : f32 to vector<16x32xf32>
    %10 = arith.mulf %8, %9 : vector<16x32xf32>
    %c0_11 = arith.constant 0 : index
    %c0_12 = arith.constant 0 : index
    %11 = vector.load %arg6[%c0_11, %c0_12] : memref<32x64xf32, #tpu.memory_space<vmem>>, vector<32x64xf32>
    %cst_13 = arith.constant dense<0.000000e+00> : vector<32x64xf32>
    %12 = tpu.matmul %6, %11, %cst_13 {dimension_numbers = #tpu.dot_dimension_numbers<[1], [0], [0], [1], [0, 0, 1, 1], [], []>} : vector<32x32xf32>, vector<32x64xf32>, vector<32x64xf32> -> vector<32x64xf32>
    %13 = vector.extract_strided_slice %12 {offsets = [0, 0], sizes = [32, 32], strides = [1, 1]} : vector<32x64xf32> to vector<32x32xf32>
    %14 = vector.extract_strided_slice %12 {offsets = [0, 32], sizes = [32, 32], strides = [1, 1]} : vector<32x64xf32> to vector<32x32xf32>
    %15 = tpu.iota {dimensions = array<i32: 0>} : vector<16x32xi32>
    %16 = tpu.iota {dimensions = array<i32: 1>} : vector<16x32xi32>
    %c8_i32 = arith.constant 8 : i32
    %17 = vector.broadcast %c8_i32 : i32 to vector<16x32xi32>
    %18 = arith.subi %16, %17 : vector<16x32xi32>
    %19 = arith.subi %18, %15 : vector<16x32xi32>
    %c-2_i32 = arith.constant -2 : i32
    %20 = vector.broadcast %c-2_i32 : i32 to vector<16x32xi32>
    %21 = arith.cmpi sge, %19, %20 : vector<16x32xi32>
    %c2_i32 = arith.constant 2 : i32
    %22 = vector.broadcast %c2_i32 : i32 to vector<16x32xi32>
    %23 = arith.cmpi sle, %19, %22 : vector<16x32xi32>
    %24 = arith.andi %21, %23 : vector<16x32xi1>
    %25 = vector.extract_strided_slice %10 {offsets = [0, 0], sizes = [16, 8], strides = [1, 1]} : vector<16x32xf32> to vector<16x8xf32>
    %26 = vector.extract_strided_slice %13 {offsets = [0, 0], sizes = [32, 8], strides = [1, 1]} : vector<32x32xf32> to vector<32x8xf32>
    %27 = vector.extract_strided_slice %14 {offsets = [0, 0], sizes = [32, 8], strides = [1, 1]} : vector<32x32xf32> to vector<32x8xf32>
    %cst_14 = arith.constant dense<0.000000e+00> : vector<16x32xf32>
    %28 = tpu.matmul %25, %26, %cst_14 {dimension_numbers = #tpu.dot_dimension_numbers<[1], [1], [0], [0], [0, 0, 1, 0], [], []>} : vector<16x8xf32>, vector<32x8xf32>, vector<16x32xf32> -> vector<16x32xf32>
    %cst_15 = arith.constant -1.000000e+30 : f32
    %29 = vector.broadcast %cst_15 : f32 to vector<16x32xf32>
    %30 = arith.select %24, %28, %29 : vector<16x32xi1>, vector<16x32xf32>
    %cst_16 = arith.constant dense<0xFF800000> : vector<16xf32>
    %31 = vector.multi_reduction <maximumf>, %30, %cst_16 [1] : vector<16x32xf32> to vector<16xf32>
    %32 = vector.shape_cast %31 : vector<16xf32> to vector<16x1xf32>
    %33 = vector.broadcast %32 : vector<16x1xf32> to vector<16x32xf32>
    %34 = arith.subf %30, %33 : vector<16x32xf32>
    %35 = math.exp %34 : vector<16x32xf32>
    %cst_17 = arith.constant dense<0.000000e+00> : vector<16xf32>
    %36 = vector.multi_reduction <add>, %35, %cst_17 [1] : vector<16x32xf32> to vector<16xf32>
    %37 = vector.shape_cast %36 : vector<16xf32> to vector<16x1xf32>
    %38 = tpu.reciprocal %37 {approx = true} : vector<16x1xf32> -> vector<16x1xf32>
    %39 = arith.mulf %37, %38 : vector<16x1xf32>
    %cst_18 = arith.constant 2.000000e+00 : f32
    %40 = vector.broadcast %cst_18 : f32 to vector<16x1xf32>
    %41 = arith.subf %40, %39 : vector<16x1xf32>
    %42 = arith.mulf %38, %41 : vector<16x1xf32>
    %cst_19 = arith.constant dense<0.000000e+00> : vector<16x8xf32>
    %43 = tpu.matmul %35, %27, %cst_19 {dimension_numbers = #tpu.dot_dimension_numbers<[1], [0], [0], [1], [0, 0, 1, 1], [], []>} : vector<16x32xf32>, vector<32x8xf32>, vector<16x8xf32> -> vector<16x8xf32>
    %44 = vector.broadcast %42 : vector<16x1xf32> to vector<16x8xf32>
    %45 = arith.mulf %43, %44 : vector<16x8xf32>
    %46 = vector.extract_strided_slice %10 {offsets = [0, 8], sizes = [16, 8], strides = [1, 1]} : vector<16x32xf32> to vector<16x8xf32>
    %47 = vector.extract_strided_slice %13 {offsets = [0, 8], sizes = [32, 8], strides = [1, 1]} : vector<32x32xf32> to vector<32x8xf32>
    %48 = vector.extract_strided_slice %14 {offsets = [0, 8], sizes = [32, 8], strides = [1, 1]} : vector<32x32xf32> to vector<32x8xf32>
    %cst_20 = arith.constant dense<0.000000e+00> : vector<16x32xf32>
    %49 = tpu.matmul %46, %47, %cst_20 {dimension_numbers = #tpu.dot_dimension_numbers<[1], [1], [0], [0], [0, 0, 1, 0], [], []>} : vector<16x8xf32>, vector<32x8xf32>, vector<16x32xf32> -> vector<16x32xf32>
    %cst_21 = arith.constant -1.000000e+30 : f32
    %50 = vector.broadcast %cst_21 : f32 to vector<16x32xf32>
    %51 = arith.select %24, %49, %50 : vector<16x32xi1>, vector<16x32xf32>
    %cst_22 = arith.constant dense<0xFF800000> : vector<16xf32>
    %52 = vector.multi_reduction <maximumf>, %51, %cst_22 [1] : vector<16x32xf32> to vector<16xf32>
    %53 = vector.shape_cast %52 : vector<16xf32> to vector<16x1xf32>
    %54 = vector.broadcast %53 : vector<16x1xf32> to vector<16x32xf32>
    %55 = arith.subf %51, %54 : vector<16x32xf32>
    %56 = math.exp %55 : vector<16x32xf32>
    %cst_23 = arith.constant dense<0.000000e+00> : vector<16xf32>
    %57 = vector.multi_reduction <add>, %56, %cst_23 [1] : vector<16x32xf32> to vector<16xf32>
    %58 = vector.shape_cast %57 : vector<16xf32> to vector<16x1xf32>
    %59 = tpu.reciprocal %58 {approx = true} : vector<16x1xf32> -> vector<16x1xf32>
    %60 = arith.mulf %58, %59 : vector<16x1xf32>
    %cst_24 = arith.constant 2.000000e+00 : f32
    %61 = vector.broadcast %cst_24 : f32 to vector<16x1xf32>
    %62 = arith.subf %61, %60 : vector<16x1xf32>
    %63 = arith.mulf %59, %62 : vector<16x1xf32>
    %cst_25 = arith.constant dense<0.000000e+00> : vector<16x8xf32>
    %64 = tpu.matmul %56, %48, %cst_25 {dimension_numbers = #tpu.dot_dimension_numbers<[1], [0], [0], [1], [0, 0, 1, 1], [], []>} : vector<16x32xf32>, vector<32x8xf32>, vector<16x8xf32> -> vector<16x8xf32>
    %65 = vector.broadcast %63 : vector<16x1xf32> to vector<16x8xf32>
    %66 = arith.mulf %64, %65 : vector<16x8xf32>
    %67 = vector.extract_strided_slice %10 {offsets = [0, 16], sizes = [16, 8], strides = [1, 1]} : vector<16x32xf32> to vector<16x8xf32>
    %68 = vector.extract_strided_slice %13 {offsets = [0, 16], sizes = [32, 8], strides = [1, 1]} : vector<32x32xf32> to vector<32x8xf32>
    %69 = vector.extract_strided_slice %14 {offsets = [0, 16], sizes = [32, 8], strides = [1, 1]} : vector<32x32xf32> to vector<32x8xf32>
    %cst_26 = arith.constant dense<0.000000e+00> : vector<16x32xf32>
    %70 = tpu.matmul %67, %68, %cst_26 {dimension_numbers = #tpu.dot_dimension_numbers<[1], [1], [0], [0], [0, 0, 1, 0], [], []>} : vector<16x8xf32>, vector<32x8xf32>, vector<16x32xf32> -> vector<16x32xf32>
    %cst_27 = arith.constant -1.000000e+30 : f32
    %71 = vector.broadcast %cst_27 : f32 to vector<16x32xf32>
    %72 = arith.select %24, %70, %71 : vector<16x32xi1>, vector<16x32xf32>
    %cst_28 = arith.constant dense<0xFF800000> : vector<16xf32>
    %73 = vector.multi_reduction <maximumf>, %72, %cst_28 [1] : vector<16x32xf32> to vector<16xf32>
    %74 = vector.shape_cast %73 : vector<16xf32> to vector<16x1xf32>
    %75 = vector.broadcast %74 : vector<16x1xf32> to vector<16x32xf32>
    %76 = arith.subf %72, %75 : vector<16x32xf32>
    %77 = math.exp %76 : vector<16x32xf32>
    %cst_29 = arith.constant dense<0.000000e+00> : vector<16xf32>
    %78 = vector.multi_reduction <add>, %77, %cst_29 [1] : vector<16x32xf32> to vector<16xf32>
    %79 = vector.shape_cast %78 : vector<16xf32> to vector<16x1xf32>
    %80 = tpu.reciprocal %79 {approx = true} : vector<16x1xf32> -> vector<16x1xf32>
    %81 = arith.mulf %79, %80 : vector<16x1xf32>
    %cst_30 = arith.constant 2.000000e+00 : f32
    %82 = vector.broadcast %cst_30 : f32 to vector<16x1xf32>
    %83 = arith.subf %82, %81 : vector<16x1xf32>
    %84 = arith.mulf %80, %83 : vector<16x1xf32>
    %cst_31 = arith.constant dense<0.000000e+00> : vector<16x8xf32>
    %85 = tpu.matmul %77, %69, %cst_31 {dimension_numbers = #tpu.dot_dimension_numbers<[1], [0], [0], [1], [0, 0, 1, 1], [], []>} : vector<16x32xf32>, vector<32x8xf32>, vector<16x8xf32> -> vector<16x8xf32>
    %86 = vector.broadcast %84 : vector<16x1xf32> to vector<16x8xf32>
    %87 = arith.mulf %85, %86 : vector<16x8xf32>
    %88 = vector.extract_strided_slice %10 {offsets = [0, 24], sizes = [16, 8], strides = [1, 1]} : vector<16x32xf32> to vector<16x8xf32>
    %89 = vector.extract_strided_slice %13 {offsets = [0, 24], sizes = [32, 8], strides = [1, 1]} : vector<32x32xf32> to vector<32x8xf32>
    %90 = vector.extract_strided_slice %14 {offsets = [0, 24], sizes = [32, 8], strides = [1, 1]} : vector<32x32xf32> to vector<32x8xf32>
    %cst_32 = arith.constant dense<0.000000e+00> : vector<16x32xf32>
    %91 = tpu.matmul %88, %89, %cst_32 {dimension_numbers = #tpu.dot_dimension_numbers<[1], [1], [0], [0], [0, 0, 1, 0], [], []>} : vector<16x8xf32>, vector<32x8xf32>, vector<16x32xf32> -> vector<16x32xf32>
    %cst_33 = arith.constant -1.000000e+30 : f32
    %92 = vector.broadcast %cst_33 : f32 to vector<16x32xf32>
    %93 = arith.select %24, %91, %92 : vector<16x32xi1>, vector<16x32xf32>
    %cst_34 = arith.constant dense<0xFF800000> : vector<16xf32>
    %94 = vector.multi_reduction <maximumf>, %93, %cst_34 [1] : vector<16x32xf32> to vector<16xf32>
    %95 = vector.shape_cast %94 : vector<16xf32> to vector<16x1xf32>
    %96 = vector.broadcast %95 : vector<16x1xf32> to vector<16x32xf32>
    %97 = arith.subf %93, %96 : vector<16x32xf32>
    %98 = math.exp %97 : vector<16x32xf32>
    %cst_35 = arith.constant dense<0.000000e+00> : vector<16xf32>
    %99 = vector.multi_reduction <add>, %98, %cst_35 [1] : vector<16x32xf32> to vector<16xf32>
    %100 = vector.shape_cast %99 : vector<16xf32> to vector<16x1xf32>
    %101 = tpu.reciprocal %100 {approx = true} : vector<16x1xf32> -> vector<16x1xf32>
    %102 = arith.mulf %100, %101 : vector<16x1xf32>
    %cst_36 = arith.constant 2.000000e+00 : f32
    %103 = vector.broadcast %cst_36 : f32 to vector<16x1xf32>
    %104 = arith.subf %103, %102 : vector<16x1xf32>
    %105 = arith.mulf %101, %104 : vector<16x1xf32>
    %cst_37 = arith.constant dense<0.000000e+00> : vector<16x8xf32>
    %106 = tpu.matmul %98, %90, %cst_37 {dimension_numbers = #tpu.dot_dimension_numbers<[1], [0], [0], [1], [0, 0, 1, 1], [], []>} : vector<16x32xf32>, vector<32x8xf32>, vector<16x8xf32> -> vector<16x8xf32>
    %107 = vector.broadcast %105 : vector<16x1xf32> to vector<16x8xf32>
    %108 = arith.mulf %106, %107 : vector<16x8xf32>
    %109 = tpu.concatenate %45, %66, %87, %108 in 1 : vector<16x8xf32>, vector<16x8xf32>, vector<16x8xf32>, vector<16x8xf32> -> vector<16x32xf32>
    %c0_38 = arith.constant 0 : index
    %c0_39 = arith.constant 0 : index
    %110 = vector.load %arg7[%c0_38, %c0_39] : memref<32x32xf32, #tpu.memory_space<vmem>>, vector<32x32xf32>
    %cst_40 = arith.constant dense<0.000000e+00> : vector<16x32xf32>
    %111 = tpu.matmul %109, %110, %cst_40 {dimension_numbers = #tpu.dot_dimension_numbers<[1], [0], [0], [1], [0, 0, 1, 1], [], []>} : vector<16x32xf32>, vector<32x32xf32>, vector<16x32xf32> -> vector<16x32xf32>
    %c0_41 = arith.constant 0 : index
    %c0_42 = arith.constant 0 : index
    %112 = vector.load %arg8[%c0_41, %c0_42] : memref<1x32xf32, #tpu.memory_space<vmem>>, vector<1x32xf32>
    %113 = vector.broadcast %112 : vector<1x32xf32> to vector<16x32xf32>
    %114 = arith.addf %111, %113 : vector<16x32xf32>
    %c0_43 = arith.constant 0 : index
    %c0_44 = arith.constant 0 : index
    %c0_45 = arith.constant 0 : index
    %115 = vector.load %arg9[%c0_43, %c0_44, %c0_45] : memref<1x16x32xf32, #tpu.memory_space<vmem>>, vector<1x16x32xf32>
    %116 = vector.shape_cast %115 : vector<1x16x32xf32> to vector<16x32xf32>
    %117 = vector.shape_cast %114 : vector<16x32xf32> to vector<1x16x32xf32>
    tpu.vector_store %arg9[%c0_43, %c0_44, %c0_45], %117 {strides = array<i32>} : memref<1x16x32xf32, #tpu.memory_space<vmem>>, vector<1x16x32xf32>,
    return
  }
  func.func @transform_0(%arg0: i32, %arg1: i32) -> (i32, i32, i32) {
    %c1_i32 = arith.constant 1 : i32
    %0 = arith.addi %arg1, %c1_i32 : i32
    %c2_i32 = arith.constant 2 : i32
    %1 = arith.muli %0, %c2_i32 : i32
    %c1_i32_0 = arith.constant 1 : i32
    %2 = arith.subi %1, %c1_i32_0 : i32
    %c0_i32 = arith.constant 0 : i32
    %c0_i32_1 = arith.constant 0 : i32
    return %arg0, %2, %c0_i32 : i32, i32, i32
  }
  func.func @transform_1(%arg0: i32, %arg1: i32) -> (i32, i32, i32) {
    %c1_i32 = arith.constant 1 : i32
    %0 = arith.addi %arg1, %c1_i32 : i32
    %c0_i32 = arith.constant 0 : i32
    %c0_i32_0 = arith.constant 0 : i32
    return %arg0, %0, %c0_i32 : i32, i32, i32
  }
  func.func @transform_2(%arg0: i32, %arg1: i32) -> (i32, i32, i32) {
    %c2_i32 = arith.constant 2 : i32
    %0 = arith.addi %arg1, %c2_i32 : i32
    %c2_i32_0 = arith.constant 2 : i32
    %1 = arith.muli %0, %c2_i32_0 : i32
    %c0_i32 = arith.constant 0 : i32
    %c0_i32_1 = arith.constant 0 : i32
    return %arg0, %1, %c0_i32 : i32, i32, i32
  }
  func.func @transform_3(%arg0: i32, %arg1: i32) -> (i32, i32) {
    %c0_i32 = arith.constant 0 : i32
    %c0_i32_0 = arith.constant 0 : i32
    %c0_i32_1 = arith.constant 0 : i32
    return %c0_i32, %c0_i32_0 : i32, i32
  }
  func.func @transform_4(%arg0: i32, %arg1: i32) -> (i32, i32) {
    %c0_i32 = arith.constant 0 : i32
    %c0_i32_0 = arith.constant 0 : i32
    %c0_i32_1 = arith.constant 0 : i32
    return %c0_i32, %c0_i32_0 : i32, i32
  }
  func.func @transform_5(%arg0: i32, %arg1: i32) -> (i32, i32) {
    %c0_i32 = arith.constant 0 : i32
    %c0_i32_0 = arith.constant 0 : i32
    %c0_i32_1 = arith.constant 0 : i32
    return %c0_i32, %c0_i32_0 : i32, i32
  }
  func.func @transform_6(%arg0: i32, %arg1: i32) -> (i32, i32) {
    %c0_i32 = arith.constant 0 : i32
    %c0_i32_0 = arith.constant 0 : i32
    %c0_i32_1 = arith.constant 0 : i32
    return %c0_i32, %c0_i32_0 : i32, i32
  }
  func.func @transform_7(%arg0: i32, %arg1: i32) -> (i32, i32, i32) {
    %c0_i32 = arith.constant 0 : i32
    %c0_i32_0 = arith.constant 0 : i32
    return %arg0, %arg1, %c0_i32 : i32, i32, i32
  }
}

</mosaic_0001>

<bundles_post_ra>
// kernel: tpu_custom_call.1
= control target key start
LH: loop header
LB: loop body
LE: loop exit
PB: predicated region body
PF: predicated region fallthrough
CT: control target
= control target key end

     0   :  { %12 = vsyncpa [#allocation3], 0  ;;  %s2759_s0 = inlined_call_operand.vmem [shape: f32[2,48,32], index: 0, kind: input, shape index: {}]   ;;  %s2760_s1 = inlined_call_operand.vmem [shape: f32[2,48,32], index: 1, kind: input, shape index: {}]   ;;  %s2761_s2 = inlined_call_operand.vmem [shape: f32[2,48,32], index: 2, kind: input, shape index: {}]   ;;  %s2762_s3 = inlined_call_operand.vmem [shape: f32[32,32], index: 3, kind: input, shape index: {}]   ;;  %s2763_s4 = inlined_call_operand.vmem [shape: f32[32,64], index: 4, kind: input, shape index: {}]   ;;  %s2764_s5 = inlined_call_operand.vmem [shape: f32[32,32], index: 5, kind: input, shape index: {}]   ;;  %s2765_s6 = inlined_call_operand.vmem [shape: f32[1,32], index: 6, kind: input, shape index: {}]   ;;  %s2766_s7 = inlined_call_operand.hbm [shape: f32[2,16,32], index: 7, kind: output, shape index: {}]  }
   0x1   :  { %14 = vsyncpa [#allocation3 + $0x1], 0  ;;  %s2414_s24 = smov 0   ;;  %s2416_s25 = smov 0  }
   0x2   :  { %s2418_s26 = smov 0   ;;  %s2420_s27 = smov 0  }
   0x3   :  { %s2422_s28 = smov 0   ;;  %s2424_s29 = smov 0  }
   0x4 LB: > { %s1753_s30 = sadd.s32 4294967295, %s2360_s29   ;;  %s1754_s8 = sadd.s32 4294967294, %s2360_s29   ;;  %s2360_s29 = sphi %s2424_s29, %s20_s29   ;;  %s2356_s28 = sphi %s2422_s28, %s2779_s28   ;;  %s2352_s27 = sphi %s2420_s27, %s2778_s27   ;;  %s2348_s26 = sphi %s2418_s26, %s2777_s26   ;;  %s2344_s25 = sphi %s2416_s25, %s2776_s25   ;;  %s2340_s24 = sphi %s2414_s24, %s2775_s24  }
   0x5   : > { %s32_s9 = sadd.s32 1, %s2356_s28  ;;  %s221_s10 = sadd.s32 1, %s2348_s26 }
   0x6   : > { %p34_p0 = scmp.ge.s32.totalorder %s32_s9, 2  ;;  %p231_p1 = scmp.ne.s32.totalorder %s2348_s26, %s2344_s25 }
   0x7   : > { %p232_p2 = scmp.eq.s32.totalorder %s1753_s30, 1  ;;  %p237_p3 = scmp.ne.s32.totalorder %s2344_s25, %s2340_s24 }
   0x8   : > { %s2781_s9 = smov (%p34_p0, %s32_s9), 0  ;;  %p238_p5 = scmp.eq.s32.totalorder %s1754_s8, 1 }
   0x9   : > { %p2454_p4 = por %p232_p2, %p231_p1  ;;  %s216_s12 = ssub.s32 %s2356_s28, %s2781_s9 }
   0xa   : > { %p1757_p6 = scmp.ge.s32.totalorder %s2360_s29, 1  ;;  %p219_p7 = scmp.eq.s32.totalorder %s216_s12, 0 }
   0xb   : > { %p2461_p8 = por %p238_p5, %p237_p3  ;;  %p315_p9 = scmp.lt.s32.totalorder %s2360_s29, 3 }
   0xc   : > { %s2467_s14 = scalar_select %p219_p7, %s2348_s26, %s221_s10  }
   0xd   : > { %p316_p10 = pnand %p1757_p6, %p315_p9 }
   0xe   : > { %v504_v0 = vld [vmem:[%s2763_s4] sm:$0xff] (!%p316_p10)  ;;  %v505_v1 = vld [vmem:[%s2763_s4 + $0x8] sm:$0xff] (!%p316_p10)  ;;  %v506_v2 = vld [vmem:[%s2763_s4 + $0x10] sm:$0xff] (!%p316_p10)  ;;  %p376_p11 = scmp.lt.s32.totalorder (!%p316_p10), %s2352_s27, 1  ;;  %vm420_vm0 = vcmask (!%p316_p10), 261120   ;;  %vm613_vm1 = vcmask (!%p316_p10), 64512   ;;  %v599_v44 = vlaneseq (!%p316_p10) }
   0xf   : > { %319 = sbr.rel (%p316_p10) target bundleno = 2370 (0x942), region = 48  ;;  %v2016_v3 = vpack.c.bf16 (!%p316_p10), %v505_v1, %v504_v0  ;;  %v507_v4 = vld [vmem:[%s2763_s4 + $0x18] sm:$0xff] (!%p316_p10)  ;;  %v416_v5 = vld [vmem:[%s2762_s3] sm:$0xff] (!%p316_p10)  ;;  %v417_v6 = vld [vmem:[%s2762_s3 + $0x8] sm:$0xff] (!%p316_p10)  ;;  %s2365_s22 = smov (!%p316_p10), 112   ;;  %vm1522_vm9 = vcmask (!%p316_p10), 130048  }
  0x10   : > { %v2020_v7 = vpack.c.bf16 (!%p316_p10), %v507_v4, %v506_v2  ;;  %v2008_v8 = vpack.c.bf16 (!%p316_p10), %v417_v6, %v416_v5  ;;  %v418_v9 = vld [vmem:[%s2762_s3 + $0x10] sm:$0xff] (!%p316_p10)  ;;  %v419_v10 = vld [vmem:[%s2762_s3 + $0x18] sm:$0xff] (!%p316_p10)  ;;  %vm2512_vm2 = vmpackc.low (!%p316_p10), %vm613_vm1, %vm613_vm1  ;;  %v600_v45 = vshrl.u32 (!%p316_p10), %v599_v44, 7  ;;  %v603_v46 = vand.u32 (!%p316_p10), 127, %v599_v44  ;;  %s2366_s23 = smov (!%p316_p10), 80   ;;  %s2368_s8 = smov (!%p316_p10), 72  }
  0x11   : > { %2017 = vmatprep.subr.bf16.mxu1 (!%p316_p10), %v2016_v3  ;;  %v2012_v11 = vpack.c.bf16 (!%p316_p10), %v419_v10, %v418_v9  ;;  %s2369_s10 = smov (!%p316_p10), 8   ;;  %vm1525_vm10 = vcmask (!%p316_p10), 195584  }
  0x12   : > { %2019 = vmatpush3.bf16.msra.mxu1 (!%p316_p10), %v2016_v3  ;;  %2009 = vmatprep.subr.bf16.mxu0 (!%p316_p10), %v2008_v8  ;;  %v601_v47 = vadd.s32 (!%p316_p10), 8, %v600_v45  ;;  %v1768_v48 = vadd.s32 (!%p316_p10), 4294967288, %v603_v46 }
  0x13   : > { %2021 = vmatprep.subr.bf16.mxu1 (!%p316_p10), %v2020_v7  ;;  %2011 = vmatpush3.bf16.msra.mxu0 (!%p316_p10), %v2008_v8 }
  0x14   : > { %2013 = vmatprep.subr.bf16.mxu0 (!%p316_p10), %v2012_v11  ;;  %v606_v49 = vsub.s32 (!%p316_p10), %v1768_v48, %v601_v47  ;;  %v605_v50 = vsub.s32 (!%p316_p10), %v1768_v48, %v600_v45 }
  0x16   : > { %s377_s12 = scalar_select %p376_p11, %s2352_s27, 1  ;;  %2023 = vmatpush3.bf16.msra.mxu1 %v2020_v7  ;;  %vm608_vm3 = vcmp.ge.s32.totalorder %v606_v49, 4294967294  ;;  %vm610_vm4 = vcmp.le.s32.totalorder %v606_v49, 2  ;;  %vm607_vm5 = vcmp.ge.s32.totalorder %v605_v50, 4294967294  ;;  %vm609_vm6 = vcmp.le.s32.totalorder %v605_v50, 2 }
  0x17   : > { %2015 = vmatpush3.bf16.msra.mxu0 %v2012_v11  ;;  %vm2548_vm7 = vmand %vm608_vm3, %vm610_vm4 }
  0x18   : > { %s2119_s19 = smul.u32 48, %s377_s12  ;;  %vm2552_vm8 = vmand %vm607_vm5, %vm609_vm6 }
  0x1a   : > { %s1810_s20 = sadd.s32 8, %s2119_s19  ;;  %s1812_s21 = sadd.s32 16, %s2119_s19 }
  0x1b   : > { %s383_s30 = scalar_lea.vmem %s2759_s0, %s1810_s20  ;;  %s396_s15 = scalar_lea.vmem %s2760_s1, %s1812_s21 }
  0x1c   : > { %v414_v12 = vld [vmem:[%s383_s30] sm:$0xff]  ;;  %v413_v14 = vld [vmem:[%s396_s15 + $0x8] sm:$0xff]  ;;  %s1814_s16 = sadd.s32 32, %s2119_s19  ;;  %s2362_s19 = smov 96  }
  0x1d   : > { %v412_v13 = vld [vmem:[%s396_s15] sm:$0xff]  ;;  %1903 = vmatprep.mubr.msk.f32.mxu1 %vm420_vm0, %v414_v12  ;;  %s408_s18 = scalar_lea.vmem %s2761_s2, %s1814_s16  ;;  %s2363_s20 = smov 120  }
  0x1e   : > { %1892 = vmatprep.mubr.msk.f32.mxu0 %vm420_vm0, %v412_v13  ;;  %1904 = vmatmul.mubr.msk.f32.vlgmr.msra.gmra.mrb[0].mxu1 %vm420_vm0, %v412_v13  ;;  %v415_v15 = vld [vmem:[%s408_s18] sm:$0xff]  ;;  %s2364_s21 = smov 88   ;;  %s2367_s30 = smov 104  }
  0x1f   : > { %1906 = vmatprep.mubr.msk.f32.mxu1 %vm420_vm0, %v413_v14  ;;  %1893 = vmatmul.mubr.msk.f32.vlgmr.msra.gmra.mrb[0].mxu0 %vm420_vm0, %v413_v14  ;;  %s2370_s15 = smov 16   ;;  %s1815_s18 = sshll.u32 %s2352_s27, 8 }
  0x22   : > { %1907 = vmatmul.mubr.msk.f32.gmra.mrb[2].mxu1 %vm420_vm0, %v415_v15 }
  0xf1   : > { %v1905_v16 = vpop.f32.mrb[0].mxu1 }
  0xf2   : > { %v580_v17 = vpop.f32.mrb[1].mxu1  ;;  %v1894_v19 = vpop.f32.mrb[0].mxu0 }
  0xf3   : > { %v2516_v20 = vpack.i.bf16 %v1905_v16, %v580_v17  ;;  %v2024_v21 = vpack.c.bf16 %v1905_v16, %v580_v17  ;;  %v493_v22 = vpop.f32.mrb[1].mxu0  ;;  %v2538_v28 = vmul.f32 0.35355338, %v1894_v19 }
  0xf4   : > { %v2518_v23 = vmul.f32 0.35355338, %v493_v22 }
  0xf5   : > { %2181 = vrot.lane.b32.xlu1 %v2516_v20, %s2362_s19  ;;  %v1908_v24 = vpop.f32.mrb[2].mxu1  ;;  %2026 = vmatprep.subr.msk.bf16.mxu0 %vm2512_vm2, %v2024_v21 }
  0xf6   : > { %v590_v25 = vpop.f32.mrb[3].mxu1  ;;  %2029 = vmatpush3.bf16.xpose.msk.msra.mxu0 %vm2512_vm2, %v2024_v21  ;;  %1917 = vmatprep.mubr.msk.f32.mxu0 %vm613_vm1, %v2518_v23 }
  0xf7   : > { %v2527_v26 = vpack.i.bf16 %v1908_v24, %v590_v25  ;;  %v2030_v27 = vpack.c.bf16 %v1908_v24, %v590_v25 }
  0xf9   : > { %2186 = vrot.lane.b32.xlu1 %v2527_v26, %s2362_s19  ;;  %2032 = vmatprep.subr.msk.bf16.mxu0 %vm2512_vm2, %v2030_v27 }
  0xfd   : > { %2196 = vrot.lane.b32.xlu1 %v2527_v26, %s2363_s20 }
  0xfe   : > { %2035 = vmatpush3.bf16.xpose.msk.msra.mxu0 %vm2512_vm2, %v2030_v27 }
 0x101   : > { %830 = vrot.lane.b32.xlu1 %v2518_v23, %s2363_s20 }
 0x105   : > { %832 = vrot.lane.b32.xlu1 %v2538_v28, %s2363_s20  ;;  %1918 = vmatmul.mubr.msk.f32.vlgmr.msra.gmra.mrb[2].mxu0 %vm613_vm1, %v2538_v28 }
 0x109   : > { %2201 = vrot.lane.b32.xlu1 %v2516_v20, %s2364_s21 }
 0x10d   : > { %2211 = vrot.lane.b32.xlu1 %v2516_v20, %s2365_s22 }
 0x167   : > { %v2182_v29 = vpop.permute.xlu1 %2181 }
 0x168   : > { %v2184_v30 = vunpack.i.h.bf16 %v2182_v29  ;;  %v2183_v31 = vunpack.i.l.bf16 %v2182_v29 }
 0x16a   : > { %v2036_v32 = vpack.c.bf16 %v2184_v30, %v2183_v31 }
 0x16b   : > { %v2187_v33 = vpop.permute.xlu1 %2186 }
 0x16c   : > { %v2189_v34 = vunpack.i.h.bf16 %v2187_v33  ;;  %v2188_v35 = vunpack.i.l.bf16 %v2187_v33  ;;  %2037 = vmatprep.subr.bf16.mxu1 %v2036_v32 }
 0x16d   : > { %2039 = vmatpush3.bf16.msra.mxu1 %v2036_v32 }
 0x16e   : > { %v2040_v36 = vpack.c.bf16 %v2189_v34, %v2188_v35 }
 0x16f   : > { %v2197_v37 = vpop.permute.xlu1 %2196 }
 0x170   : > { %2041 = vmatprep.subr.bf16.mxu1 %v2040_v36  ;;  %v2199_v5 = vunpack.i.h.bf16 %v2197_v37  ;;  %v2198_v6 = vunpack.i.l.bf16 %v2197_v37 }
 0x171   : > { %2043 = vmatpush3.bf16.msra.mxu1 %v2040_v36 }
 0x172   : > { %v2050_v9 = vpack.c.bf16 %v2199_v5, %v2198_v6 }
 0x173   : > { %v831_v38 = vpop.permute.xlu1 %830 }
 0x177   : > { %v833_v39 = vpop.permute.xlu1 %832 }
 0x17b   : > { %v2202_v40 = vpop.permute.xlu1 %2201 }
 0x17c   : > { %v2204_v41 = vunpack.i.h.bf16 %v2202_v40  ;;  %v2203_v42 = vunpack.i.l.bf16 %v2202_v40 }
 0x17e   : > { %v2056_v43 = vpack.c.bf16 %v2204_v41, %v2203_v42 }
 0x17f   : > { %v2212_v19 = vpop.permute.xlu1 %2211 }
 0x180   : > { %2057 = vmatprep.subr.bf16.mxu0 %v2056_v43  ;;  %v2214_v31 = vunpack.i.h.bf16 %v2212_v19  ;;  %v2213_v32 = vunpack.i.l.bf16 %v2212_v19 }
 0x181   : > { %2059 = vmatpush3.bf16.msra.mxu0 %v2056_v43 }
 0x182   : > { %v2064_v36 = vpack.c.bf16 %v2214_v31, %v2213_v32 }
 0x1d8   : > { %v1919_v52 = vpop.f32.mrb[2].mxu0 }
 0x1d9   : > { %v708_v54 = vsel %vm2548_vm7, %v1919_v52, -1e+30  ;;  %v698_v55 = vpop.f32.mrb[3].mxu0 }
 0x1da   : > { %v712_v56 = vsel %vm420_vm0, %v708_v54, -inf  ;;  %v707_v57 = vsel %vm2552_vm8, %v698_v55, -1e+30 }
 0x1db   : > { %713 = vmax.xlane.f32.xlu0 %v712_v56  ;;  %v709_v58 = vsel %vm420_vm0, %v707_v57, -inf }
 0x1df   : > { %710 = vmax.xlane.f32.xlu0 %v709_v58 }
 0x1f5   : > { %2191 = vrot.lane.b32.xlu0 %v2516_v20, %s2363_s20 }
 0x268   : > { %v714_v59 = vpop.xlane.xlu0 %713 }
 0x269   : > { %v716_v60 = vsub.f32 %v708_v54, %v714_v59 }
 0x26b   : > { %v719_v63 = vmul.f32 1.442695, %v716_v60 }
 0x26c   : > { %v711_v61 = vpop.xlane.xlu0 %710 }
 0x26d   : > { %v715_v62 = vsub.f32 %v707_v57, %v711_v61 }
 0x26f   : > { %v717_v0 = vmul.f32 1.442695, %v715_v62 }
 0x270   : > { %v2192_v1 = vpop.permute.xlu0 %2191 }
 0x271   : > { %2250 = vpow2.f32 %v717_v0  ;;  %v2194_v2 = vunpack.i.h.bf16 %v2192_v1  ;;  %v2193_v3 = vunpack.i.l.bf16 %v2192_v1 }
 0x272   : > { %2252 = vpow2.f32 %v719_v63 }
 0x273   : > { %v2044_v4 = vpack.c.bf16 %v2194_v2, %v2193_v3 }
 0x275   : > { %2046 = vmatprep.subr.msk.bf16.mxu1 %vm2512_vm2, %v2044_v4 }
 0x27b   : > { %v2566_v7 = vpop.eup %2250 }
 0x27c   : > { %v2568_v8 = vpop.eup %2252  ;;  %1928 = vmatprep.mubr.msk.f32.mxu1 %vm420_vm0, %v2566_v7 }
 0x27d   : > { %1929 = vmatmul.mubr.msk.f32.vlgmr.msra.gmra.mrb[4].mxu1 %vm420_vm0, %v2568_v8 }
 0x27e   : > { %2049 = vmatpush3.bf16.xpose.msk.msra.mxu1 %vm2512_vm2, %v2044_v4  ;;  %1939 = vmatprep.mubr.msk.f32.mxu1 %vm613_vm1, %v831_v38 }
 0x27f   : > { %2052 = vmatprep.subr.msk.bf16.mxu1 %vm2512_vm2, %v2050_v9 }
 0x286   : > { %2055 = vmatpush3.bf16.xpose.msk.msra.mxu1 %vm2512_vm2, %v2050_v9 }
 0x28d   : > { %1940 = vmatmul.mubr.msk.f32.vlgmr.msra.gmra.mrb[6].mxu1 %vm613_vm1, %v833_v39 }
 0x350   : > { %v2582_v10 = vpop.f32.mrb[4].mxu1 }
 0x351   : > { %v2584_v11 = vpop.f32.mrb[5].mxu1 }
 0x360   : > { %v1941_v12 = vpop.f32.mrb[6].mxu1 }
 0x361   : > { %v930_v13 = vsel %vm2548_vm7, %v1941_v12, -1e+30  ;;  %v920_v14 = vpop.f32.mrb[7].mxu1 }
 0x362   : > { %v929_v15 = vsel %vm2552_vm8, %v920_v14, -1e+30  ;;  %v934_v16 = vsel %vm420_vm0, %v930_v13, -inf }
 0x363   : > { %935 = vmax.xlane.f32.xlu0 %v934_v16  ;;  %v931_v17 = vsel %vm420_vm0, %v929_v15, -inf }
 0x364   : > { %932 = vmax.xlane.f32.xlu1 %v931_v17 }
 0x375   : > { %2216 = vrot.lane.b32.xlu1 %v2527_v26, %s2365_s22 }
 0x379   : > { %2206 = vrot.lane.b32.xlu0 %v2527_v26, %s2364_s21  ;;  %1052 = vrot.lane.b32.xlu1 %v2518_v23, %s2365_s22  ;;  %s2708_s21 = scalar_lea.hbm %s2766_s7, %s1815_s18 }
 0x37d   : > { %1054 = vrot.lane.b32.xlu0 %v2538_v28, %s2365_s22  ;;  %2226 = vrot.lane.b32.xlu1 %v2527_v26, %s2366_s23 }
 0x3f0   : > { %v936_v21 = vpop.xlane.xlu0 %935 }
 0x3f1   : > { %v938_v22 = vsub.f32 %v930_v13, %v936_v21  ;;  %v933_v24 = vpop.xlane.xlu1 %932 }
 0x3f2   : > { %v937_v25 = vsub.f32 %v929_v15, %v933_v24 }
 0x3f3   : > { %v941_v27 = vmul.f32 1.442695, %v938_v22 }
 0x3f4   : > { %v939_v29 = vmul.f32 1.442695, %v937_v25  ;;  %v2207_v30 = vpop.permute.xlu0 %2206 }
 0x3f5   : > { %v2209_v33 = vunpack.i.h.bf16 %v2207_v30  ;;  %v2208_v34 = vunpack.i.l.bf16 %v2207_v30  ;;  %v2217_v37 = vpop.permute.xlu1 %2216 }
 0x3f6   : > { %2254 = vpow2.f32 %v939_v29  ;;  %v2219_v38 = vunpack.i.h.bf16 %v2217_v37  ;;  %v2218_v39 = vunpack.i.l.bf16 %v2217_v37 }
 0x3f7   : > { %2256 = vpow2.f32 %v941_v27  ;;  %v2060_v35 = vpack.c.bf16 %v2209_v33, %v2208_v34 }
 0x3f8   : > { %v2070_v42 = vpack.c.bf16 %v2219_v38, %v2218_v39  ;;  %v1055_v44 = vpop.permute.xlu0 %1054 }
 0x3f9   : > { %2061 = vmatprep.subr.bf16.mxu0 %v2060_v35  ;;  %v1053_v43 = vpop.permute.xlu1 %1052 }
 0x3fa   : > { %2063 = vmatpush3.bf16.msra.mxu0 %v2060_v35 }
 0x3fb   : > { %2066 = vmatprep.subr.msk.bf16.mxu0 %vm2512_vm2, %v2064_v36 }
 0x3fd   : > { %v2227_v55 = vpop.permute.xlu1 %2226 }
 0x3fe   : > { %v2229_v63 = vunpack.i.h.bf16 %v2227_v55  ;;  %v2228_v0 = vunpack.i.l.bf16 %v2227_v55 }
 0x400   : > { %v2604_v40 = vpop.eup %2254  ;;  %v2080_v4 = vpack.c.bf16 %v2229_v63, %v2228_v0 }
 0x401   : > { %v2606_v41 = vpop.eup %2256  ;;  %1950 = vmatprep.mubr.msk.f32.mxu0 %vm420_vm0, %v2604_v40  ;;  %v943_v51 = vsel %vm420_vm0, %v2604_v40, 0.0 }
 0x402   : > { %1951 = vmatmul.mubr.msk.f32.vlgmr.msra.gmra.mrb[4].mxu0 %vm420_vm0, %v2606_v41  ;;  %v946_v31 = vsel %vm420_vm0, %v2606_v41, 0.0 }
 0x403   : > { %2069 = vmatpush3.bf16.xpose.msk.msra.mxu0 %vm2512_vm2, %v2064_v36  ;;  %1961 = vmatprep.mubr.msk.f32.mxu0 %vm613_vm1, %v1053_v43 }
 0x404   : > { %2072 = vmatprep.subr.msk.bf16.mxu0 %vm2512_vm2, %v2070_v42 }
 0x40b   : > { %2075 = vmatpush3.bf16.xpose.msk.msra.mxu0 %vm2512_vm2, %v2070_v42 }
 0x412   : > { %1962 = vmatmul.mubr.msk.f32.vlgmr.msra.gmra.mrb[6].mxu0 %vm613_vm1, %v1055_v44 }
 0x4d5   : > { %v2620_v45 = vpop.f32.mrb[4].mxu0 }
 0x4d6   : > { %v2622_v46 = vpop.f32.mrb[5].mxu0 }
 0x4e5   : > { %v1963_v47 = vpop.f32.mrb[6].mxu0 }
 0x4e6   : > { %v1152_v48 = vsel %vm2548_vm7, %v1963_v47, -1e+30  ;;  %v1142_v49 = vpop.f32.mrb[7].mxu0 }
 0x4e7   : > { %v1151_v50 = vsel %vm2552_vm8, %v1142_v49, -1e+30  ;;  %v1156_v52 = vsel %vm420_vm0, %v1152_v48, -inf }
 0x4e8   : > { %1157 = vmax.xlane.f32.xlu0 %v1156_v52  ;;  %v1153_v54 = vsel %vm420_vm0, %v1151_v50, -inf  ;;  %v724_v52 = vsel %vm420_vm0, %v2568_v8, 0.0 }
 0x4e9   : > { %1154 = vmax.xlane.f32.xlu1 %v1153_v54  ;;  %v721_v54 = vsel %vm420_vm0, %v2566_v7, 0.0 }
 0x4fa   : > { %2231 = vrot.lane.b32.xlu1 %v2516_v20, %s2367_s30 }
 0x4fe   : > { %2221 = vrot.lane.b32.xlu0 %v2516_v20, %s2366_s23  ;;  %1274 = vrot.lane.b32.xlu1 %v2518_v23, %s2367_s30  ;;  %s2371_s23 = smov 24  }
 0x502   : > { %2236 = vrot.lane.b32.xlu0 %v2527_v26, %s2367_s30 }
 0x506   : > { %1276 = vrot.lane.b32.xlu0 %v2538_v28, %s2367_s30  ;;  %s370_s30 = sand.u32 1, %s2344_s25  }
 0x507   : > { %s2712_s22 = scalar_lea.sflag [#allocation3], %s370_s30 }
 0x575   : > { %v1158_v56 = vpop.xlane.xlu0 %1157 }
 0x576   : > { %v1160_v57 = vsub.f32 %v1152_v48, %v1158_v56  ;;  %v1155_v58 = vpop.xlane.xlu1 %1154 }
 0x577   : > { %v1159_v59 = vsub.f32 %v1151_v50, %v1155_v58 }
 0x578   : > { %v1163_v60 = vmul.f32 1.442695, %v1160_v57 }
 0x579   : > { %v1161_v61 = vmul.f32 1.442695, %v1159_v59  ;;  %v2222_v62 = vpop.permute.xlu0 %2221 }
 0x57a   : > { %v2224_v1 = vunpack.i.h.bf16 %v2222_v62  ;;  %v2223_v2 = vunpack.i.l.bf16 %v2222_v62  ;;  %v2232_v3 = vpop.permute.xlu1 %2231 }
 0x57b   : > { %2258 = vpow2.f32 %v1161_v61  ;;  %v2234_v5 = vunpack.i.h.bf16 %v2232_v3  ;;  %v2233_v6 = vunpack.i.l.bf16 %v2232_v3 }
 0x57c   : > { %2260 = vpow2.f32 %v1163_v60  ;;  %v2076_v23 = vpack.c.bf16 %v2224_v1, %v2223_v2 }
 0x57d   : > { %v2084_v28 = vpack.c.bf16 %v2234_v5, %v2233_v6  ;;  %v2237_v9 = vpop.permute.xlu0 %2236 }
 0x57e   : > { %2077 = vmatprep.subr.bf16.mxu1 %v2076_v23  ;;  %v2239_v14 = vunpack.i.h.bf16 %v2237_v9  ;;  %v2238_v15 = vunpack.i.l.bf16 %v2237_v9  ;;  %v1275_v16 = vpop.permute.xlu1 %1274 }
 0x57f   : > { %2079 = vmatpush3.bf16.msra.mxu1 %v2076_v23 }
 0x580   : > { %2081 = vmatprep.subr.bf16.mxu1 %v2080_v4  ;;  %v2090_v17 = vpack.c.bf16 %v2239_v14, %v2238_v15  ;;  %v1530_v15 = vld [vmem:[%s2764_s5 + $0x10] sm:$0xff] }
 0x581   : > { %v1277_v19 = vpop.permute.xlu0 %1276 }
 0x583   : > { %2083 = vmatpush3.bf16.msra.mxu1 %v2080_v4 }
 0x584   : > { %2086 = vmatprep.subr.msk.bf16.mxu1 %vm2512_vm2, %v2084_v28 }
 0x585   : > { %v2259_v12 = vpop.eup %2258 }
 0x586   : > { %v2261_v13 = vpop.eup %2260  ;;  %1972 = vmatprep.mubr.msk.f32.mxu1 %vm420_vm0, %v2259_v12  ;;  %v1165_v53 = vsel %vm420_vm0, %v2259_v12, 0.0 }
 0x587   : > { %1973 = vmatmul.mubr.msk.f32.vlgmr.msra.gmra.mrb[8].mxu1 %vm420_vm0, %v2261_v13  ;;  %v1168_v32 = vsel %vm420_vm0, %v2261_v13, 0.0 }
 0x588   : > { %1983 = vmatprep.mubr.msk.f32.mxu1 %vm613_vm1, %v1275_v16 }
 0x58c   : > { %2089 = vmatpush3.bf16.xpose.msk.msra.mxu1 %vm2512_vm2, %v2084_v28 }
 0x58d   : > { %2092 = vmatprep.subr.msk.bf16.mxu1 %vm2512_vm2, %v2090_v17 }
 0x594   : > { %2095 = vmatpush3.bf16.xpose.msk.msra.mxu1 %vm2512_vm2, %v2090_v17  ;;  %v1531_v17 = vld [vmem:[%s2764_s5 + $0x18] sm:$0xff] }
 0x59b   : > { %1984 = vmatmul.mubr.msk.f32.vlgmr.msra.gmra.mrb[10].mxu1 %vm613_vm1, %v1277_v19  ;;  %v2108_v19 = vpack.c.bf16 %v1531_v17, %v1530_v15 }
 0x65a   : > { %v2648_v21 = vpop.f32.mrb[8].mxu1 }
 0x65b   : > { %v2650_v22 = vpop.f32.mrb[9].mxu1 }
 0x66e   : > { %v1985_v24 = vpop.f32.mrb[10].mxu1 }
 0x66f   : > { %v1374_v25 = vsel %vm2548_vm7, %v1985_v24, -1e+30  ;;  %v1364_v27 = vpop.f32.mrb[11].mxu1 }
 0x670   : > { %v1373_v29 = vsel %vm2552_vm8, %v1364_v27, -1e+30  ;;  %v1378_v30 = vsel %vm420_vm0, %v1374_v25, -inf }
 0x671   : > { %1379 = vmax.xlane.f32.xlu0 %v1378_v30  ;;  %v1375_v18 = vsel %vm420_vm0, %v1373_v29, -inf }
 0x672   : > { %1376 = vmax.xlane.f32.xlu1 %v1375_v18 }
 0x683   : > { %2246 = vrot.lane.b32.xlu1 %v2527_v26, %s2368_s8 }
 0x687   : > { %2241 = vrot.lane.b32.xlu0 %v2516_v20, %s2368_s8  ;;  %s1758_s8 = sshll.u32 %s370_s30, 4 }
 0x688   : > { %s372_s12 = scalar_lea.vmem [#allocation2], %s1758_s8 }
 0x689   : > { %s1638_s17 = sshll.u32 %s372_s12, 4  ;;  %s2703_s17 = int_to_ptr.vmem [resolvable:$true] %s1638_s17 }
 0x68a   : > { %s2282_s27 = scalar_lea.vmem %s2703_s17, 256 }
 0x68b   : > { %p2283_p12 = scmp.ne.s32.totalorder %s2703_s17, %s2282_s27 }
 0x68d   : > { %p2284_p13 = pnand %p2283_p12, %p2454_p4 }
 0x68f   : > { %p2285_p0 = pneg %p2284_p13 }
 0x6a6   : > { %947 = vadd.xlane.f32.xlu0 %v946_v31 }
 0x6a7   : > { %944 = vadd.xlane.f32.xlu1 %v943_v51 }
 0x6aa   : > { %1166 = vadd.xlane.f32.xlu0 %v1165_v53 }
 0x6ab   : > { %1169 = vadd.xlane.f32.xlu1 %v1168_v32 }
 0x6fe   : > { %v1380_v33 = vpop.xlane.xlu0 %1379 }
 0x6ff   : > { %v1382_v34 = vsub.f32 %v1374_v25, %v1380_v33  ;;  %v1377_v35 = vpop.xlane.xlu1 %1376 }
 0x700   : > { %v1381_v26 = vsub.f32 %v1373_v29, %v1377_v35 }
 0x701   : > { %v1385_v36 = vmul.f32 1.442695, %v1382_v34 }
 0x702   : > { %v1383_v20 = vmul.f32 1.442695, %v1381_v26  ;;  %v2242_v37 = vpop.permute.xlu0 %2241 }
 0x703   : > { %2262 = vpow2.f32 %v1385_v36  ;;  %v2244_v38 = vunpack.i.h.bf16 %v2242_v37  ;;  %v2243_v39 = vunpack.i.l.bf16 %v2242_v37  ;;  %v2247_v41 = vpop.permute.xlu1 %2246 }
 0x704   : > { %2264 = vpow2.f32 %v1383_v20  ;;  %v2249_v40 = vunpack.i.h.bf16 %v2247_v41  ;;  %v2248_v42 = vunpack.i.l.bf16 %v2247_v41 }
 0x705   : > { %v2096_v43 = vpack.c.bf16 %v2244_v38, %v2243_v39 }
 0x706   : > { %v2100_v44 = vpack.c.bf16 %v2249_v40, %v2248_v42 }
 0x707   : > { %2097 = vmatprep.subr.bf16.mxu0 %v2096_v43 }
 0x708   : > { %2099 = vmatpush3.bf16.msra.mxu0 %v2096_v43 }
 0x709   : > { %2101 = vmatprep.subr.bf16.mxu0 %v2100_v44 }
 0x70c   : > { %2103 = vmatpush3.bf16.msra.mxu0 %v2100_v44 }
 0x70d   : > { %v2263_v47 = vpop.eup %2262 }
 0x70e   : > { %v2265_v48 = vpop.eup %2264  ;;  %v1390_v49 = vsel %vm420_vm0, %v2263_v47, 0.0 }
 0x70f   : > { %1391 = vadd.xlane.f32.xlu1 %v1390_v49  ;;  %1994 = vmatprep.mubr.msk.f32.mxu0 %vm420_vm0, %v2265_v48  ;;  %v1387_v50 = vsel %vm420_vm0, %v2265_v48, 0.0 }
 0x710   : > { %1388 = vadd.xlane.f32.xlu0 %v1387_v50  ;;  %1995 = vmatmul.mubr.msk.f32.vlgmr.msra.gmra.mrb[8].mxu0 %vm420_vm0, %v2263_v47 }
 0x713   : > { %725 = vadd.xlane.f32.xlu1 %v724_v52 }
 0x714   : > { %722 = vadd.xlane.f32.xlu0 %v721_v54 }
 0x733   : > { %v948_v55 = vpop.xlane.xlu0 %947 }
 0x734   : > { %2266 = vrcp.f32 %v948_v55  ;;  %v945_v56 = vpop.xlane.xlu1 %944 }
 0x735   : > { %2268 = vrcp.f32 %v945_v56 }
 0x737   : > { %v1167_v57 = vpop.xlane.xlu0 %1166 }
 0x738   : > { %2270 = vrcp.f32 %v1167_v57  ;;  %v1170_v58 = vpop.xlane.xlu1 %1169 }
 0x739   : > { %2272 = vrcp.f32 %v1170_v58 }
 0x73e   : > { %v2267_v59 = vpop.eup %2266 }
 0x73f   : > { %v2269_v60 = vpop.eup %2268  ;;  %v952_v61 = vmul.f32 %v2267_v59, %v948_v55 }
 0x740   : > { %v951_v62 = vmul.f32 %v2269_v60, %v945_v56 }
 0x741   : > { %v954_v63 = vsub.f32 2.0, %v952_v61 }
 0x742   : > { %v2271_v0 = vpop.eup %2270  ;;  %v953_v8 = vsub.f32 2.0, %v951_v62 }
 0x743   : > { %v2273_v1 = vpop.eup %2272  ;;  %v956_v2 = vmul.f32 %v2267_v59, %v954_v63  ;;  %v1173_v3 = vmul.f32 %v2271_v0, %v1167_v57 }
 0x744   : > { %v955_v7 = vmul.f32 %v2269_v60, %v953_v8  ;;  %v1174_v23 = vmul.f32 %v2273_v1, %v1170_v58 }
 0x745   : > { %v1175_v4 = vsub.f32 2.0, %v1173_v3  ;;  %v1051_v5 = vmul.f32 %v2620_v45, %v956_v2  ;;  %v1528_v45 = vld [vmem:[%s2764_s5] sm:$0xff] }
 0x746   : > { %v1176_v6 = vsub.f32 2.0, %v1174_v23  ;;  %v1050_v28 = vmul.f32 %v2622_v46, %v955_v7  ;;  %v1529_v46 = vld [vmem:[%s2764_s5 + $0x8] sm:$0xff] }
 0x747   : > { %v1177_v9 = vmul.f32 %v2271_v0, %v1175_v4  ;;  %1500 = vrot.lane.b32.xlu1 %v1051_v5, %s2369_s10  ;;  %v2104_v16 = vpack.c.bf16 %v1529_v46, %v1528_v45 }
 0x748   : > { %v1178_v12 = vmul.f32 %v2273_v1, %v1176_v6  ;;  %1498 = vrot.lane.b32.xlu0 %v1050_v28, %s2369_s10 }
 0x749   : > { %v1272_v13 = vmul.f32 %v2650_v22, %v1177_v9  ;;  %2105 = vmatprep.subr.bf16.mxu0 %v2104_v16 }
 0x74a   : > { %v1273_v14 = vmul.f32 %v2648_v21, %v1178_v12  ;;  %2107 = vmatpush3.bf16.msra.mxu0 %v2104_v16 }
 0x74b   : > { %1506 = vrot.lane.b32.xlu1 %v1272_v13, %s2370_s15  ;;  %2109 = vmatprep.subr.bf16.mxu0 %v2108_v19 }
 0x74c   : > { %1508 = vrot.lane.b32.xlu0 %v1273_v14, %s2370_s15 }
 0x74e   : > { %2111 = vmatpush3.bf16.msra.mxu0 %v2108_v19 }
 0x79c   : > { %v1392_v21 = vpop.xlane.xlu1 %1391 }
 0x79d   : > { %v1389_v22 = vpop.xlane.xlu0 %1388  ;;  %2274 = vrcp.f32 %v1392_v21 }
 0x79e   : > { %2276 = vrcp.f32 %v1389_v22 }
 0x7a0   : > { %v726_v26 = vpop.xlane.xlu1 %725 }
 0x7a1   : > { %v723_v35 = vpop.xlane.xlu0 %722 }
 0x7a2   : > { %2278 = vrcp.f32 %v723_v35 }
 0x7a3   : > { %2280 = vrcp.f32 %v726_v26 }
 0x7a7   : > { %v2275_v24 = vpop.eup %2274 }
 0x7a8   : > { %v2277_v25 = vpop.eup %2276  ;;  %v1396_v27 = vmul.f32 %v2275_v24, %v1392_v21 }
 0x7a9   : > { %v1395_v29 = vmul.f32 %v2277_v25, %v1389_v22 }
 0x7aa   : > { %v1398_v30 = vsub.f32 2.0, %v1396_v27 }
 0x7ab   : > { %v1397_v18 = vsub.f32 2.0, %v1395_v29 }
 0x7ac   : > { %v1400_v31 = vmul.f32 %v2275_v24, %v1398_v30  ;;  %v2279_v36 = vpop.eup %2278 }
 0x7ad   : > { %v1399_v53 = vmul.f32 %v2277_v25, %v1397_v18  ;;  %v2281_v20 = vpop.eup %2280  ;;  %v729_v37 = vmul.f32 %v2279_v36, %v723_v35 }
 0x7ae   : > { %v730_v38 = vmul.f32 %v2281_v20, %v726_v26 }
 0x7af   : > { %v731_v39 = vsub.f32 2.0, %v729_v37 }
 0x7b0   : > { %v732_v40 = vsub.f32 2.0, %v730_v38 }
 0x7b1   : > { %v733_v43 = vmul.f32 %v2279_v36, %v731_v39 }
 0x7b2   : > { %v734_v44 = vmul.f32 %v2281_v20, %v732_v40 }
 0x7b3   : > { %v828_v49 = vmul.f32 %v2584_v11, %v733_v43 }
 0x7b4   : > { %v829_v50 = vmul.f32 %v2582_v10, %v734_v44  ;;  %v1801_v10 = vld [vmem:[%s2765_s6] ss:$0 sm:$0xff] }
 0x7b9   : > { %v1501_v42 = vpop.permute.xlu1 %1500 }
 0x7ba   : > { %v1499_v41 = vpop.permute.xlu0 %1498  ;;  %v1521_v55 = vsel %vm613_vm1, %v829_v50, %v1501_v42 }
 0x7bb   : > { %v1520_v52 = vsel %vm613_vm1, %v828_v49, %v1499_v41 }
 0x7bd   : > { %v1507_v48 = vpop.permute.xlu1 %1506 }
 0x7be   : > { %v1509_v47 = vpop.permute.xlu0 %1508  ;;  %v1523_v56 = vsel %vm1522_vm9, %v1520_v52, %v1507_v48 }
 0x7bf   : > { %v1524_v58 = vsel %vm1522_vm9, %v1521_v55, %v1509_v47 }
 0x7e3   : > { %v1996_v51 = vpop.f32.mrb[8].mxu0 }
 0x7e4   : > { %v1495_v32 = vmul.f32 %v1996_v51, %v1400_v31  ;;  %v1485_v33 = vpop.f32.mrb[9].mxu0 }
 0x7e5   : > { %v1494_v34 = vmul.f32 %v1485_v33, %v1399_v53 }
 0x7e6   : > { %1516 = vrot.lane.b32.xlu0 %v1495_v32, %s2371_s23 }
 0x7e7   : > { %1514 = vrot.lane.b32.xlu1 %v1494_v34, %s2371_s23  ;;  %s2372_s23 = smov [#allocation2]  }
 0x7e8   : > { %s2286_s8 = sshll.u32 %s2372_s23, 4  ;;  %s2287_s8 = int_to_ptr.vmem [resolvable:$false] %s2286_s8 }
 0x7e9   : > { %s2288_s15 = scalar_lea.vmem %s2287_s8, 512  ;;  %p2289_p1 = scmp.lt.s32.totalorder %s2703_s17, %s2287_s8 }
 0x7ea   : > { %p2290_p2 = scmp.lt.s32.totalorder %s2288_s15, %s2282_s27 }
 0x7ec   : > { %p2291_p3 = por %p2290_p2, %p2289_p1 }
 0x7ee   : > { %p2292_p5 = pnand %p2291_p3, %p2285_p0 }
 0x858   : > { %v1517_v54 = vpop.permute.xlu0 %1516 }
 0x859   : > { %v1515_v57 = vpop.permute.xlu1 %1514  ;;  %v1527_v60 = vsel %vm1525_vm10, %v1524_v58, %v1517_v54 }
 0x85a   : > { %v1526_v59 = vsel %vm1525_vm10, %v1523_v56, %v1515_v57 }
 0x85b   : > { %2005 = vmatprep.mubr.msk.f32.mxu0 %vm420_vm0, %v1526_v59 }
 0x85c   : > { %2006 = vmatmul.mubr.msk.f32.vlgmr.msra.gmra.mrb[10].mxu0 %vm420_vm0, %v1527_v60 }
 0x92f   : > { %v2007_v11 = vpop.f32.mrb[10].mxu0 }
 0x930   : > { %v1617_v61 = vadd.f32 %v2007_v11, %v1801_v10  ;;  %v1611_v62 = vpop.f32.mrb[11].mxu0 }
 0x931   : > { %v1612_v63 = vadd.f32 %v1801_v10, %v1611_v62 }
 0x932   : > { %1621 = vst.msk [vmem:[%s372_s12 + $0x8] sm:$0xff] %vm420_vm0, %v1617_v61 }
 0x933   : > { %1620 = vst.msk [vmem:[%s372_s12] sm:$0xff] %vm420_vm0, %v1612_v63 }
 0x934   : > { %2295 = shalt.err (!%p2292_p5)
}
 0x935   : > { %s2296_s30 = scalar_lea.hbm %s2708_s21, 256  ;;  %s2300_s18 = scalar_lea.hbm %s2766_s7, 512 }
 0x936   : > { %p2297_p6 = scmp.ne.s32.totalorder %s2708_s21, %s2296_s30  ;;  %p2301_p10 = scmp.lt.u32.totalorder %s2708_s21, %s2766_s7 }
 0x937   : > { %p2302_p11 = scmp.lt.u32.totalorder %s2300_s18, %s2296_s30  ;;  %p2304_p13 = scmp.lt.u32.totalorder %s2296_s30, %s2708_s21 }
 0x938   : > { %p2298_p7 = pnand %p2297_p6, %p2454_p4 }
 0x939   : > { %p2303_p12 = por %p2302_p11, %p2301_p10 }
 0x93a   : > { %p2299_p9 = pneg %p2298_p7 }
 0x93b   : > { %p2305_p0 = por %p2304_p13, %p2303_p12 }
 0x93d   : > { %p2306_p1 = pnand %p2305_p0, %p2299_p9 }
 0x93f   : > { %2309 = shalt.err (!%p2306_p1)
}
 0x940   : > { %s2373_s27 = smov 128  }
 0x941   : > { %2113 = dma.vmem_to_hbm [thread:$0]  (%p2454_p4), %s2703_s17, 256, %s2708_s21, %s2712_s22, %s2373_s27, %s2373_s27, %s2369_s10  }
 0x942 PF: > { %p2120_p2 = scmp.ge.s32.totalorder %s2360_s29, 2  ;;  %s1653_s23 = sand.u32 1, %s2340_s24  }
 0x943   : > { %s1654_s8 = scalar_lea.sflag [#allocation3], %s1653_s23 }
 0x944   : > { %p2116_p3 = pnand %p2120_p2, %p2461_p8 }
 0x946   : > { %2335 = dma.done.wait (!%p2116_p3), %s1654_s8, 256  }
 0x947   : > { %2337 = vsyncadd (!%p2116_p3), %s1654_s8, 4294967040  ;;  %s20_s29 = sadd.s32 1, %s2360_s29   ;;  %s2775_s24 = smov %s2344_s25 }
 0x948   : > { %p17_p5 = scmp.ge.s32.totalorder %s20_s29, 4   ;;  %s2776_s25 = smov %s2348_s26 }
 0x949   : > { %s2777_s26 = smov %s2467_s14  ;;  %s2778_s27 = smov %s2356_s28 }
 0x94a   : > { %s2779_s28 = smov %s2781_s9  ;;  %19 = sbr.rel (!%p17_p5) target bundleno = 4 (0x4), region = 89 }
 0x951   :  { %1659 = vsyncpa [#allocation3], 1 }
 0x952   :  { %1661 = vsyncpa [#allocation3 + $0x1], 1 }

// kernel: tpu_custom_call.1
= control target key start
LH: loop header
LB: loop body
LE: loop exit
PB: predicated region body
PF: predicated region fallthrough
CT: control target
= control target key end

     0   :  { %12 = vsyncpa [#allocation3], 0  ;;  %s2759_s0 = inlined_call_operand.vmem [shape: f32[2,48,32], index: 0, kind: input, shape index: {}]   ;;  %s2760_s1 = inlined_call_operand.vmem [shape: f32[2,48,32], index: 1, kind: input, shape index: {}]   ;;  %s2761_s2 = inlined_call_operand.vmem [shape: f32[2,48,32], index: 2, kind: input, shape index: {}]   ;;  %s2762_s3 = inlined_call_operand.vmem [shape: f32[32,32], index: 3, kind: input, shape index: {}]   ;;  %s2763_s4 = inlined_call_operand.vmem [shape: f32[32,64], index: 4, kind: input, shape index: {}]   ;;  %s2764_s5 = inlined_call_operand.vmem [shape: f32[32,32], index: 5, kind: input, shape index: {}]   ;;  %s2765_s6 = inlined_call_operand.vmem [shape: f32[1,32], index: 6, kind: input, shape index: {}]   ;;  %s2766_s7 = inlined_call_operand.hbm [shape: f32[2,16,32], index: 7, kind: output, shape index: {}]  }
   0x1   :  { %14 = vsyncpa [#allocation3 + $0x1], 0  ;;  %s2414_s24 = smov 0   ;;  %s2416_s25 = smov 0  }
   0x2   :  { %s2418_s26 = smov 0   ;;  %s2420_s27 = smov 0  }
   0x3   :  { %s2422_s28 = smov 0   ;;  %s2424_s29 = smov 0  }
   0x4 LB: > { %s1753_s30 = sadd.s32 4294967295, %s2360_s29   ;;  %s1754_s8 = sadd.s32 4294967294, %s2360_s29   ;;  %s2360_s29 = sphi %s2424_s29, %s20_s29   ;;  %s2356_s28 = sphi %s2422_s28, %s2779_s28   ;;  %s2352_s27 = sphi %s2420_s27, %s2778_s27   ;;  %s2348_s26 = sphi %s2418_s26, %s2777_s26   ;;  %s2344_s25 = sphi %s2416_s25, %s2776_s25   ;;  %s2340_s24 = sphi %s2414_s24, %s2775_s24  }
   0x5   : > { %s32_s9 = sadd.s32 1, %s2356_s28  ;;  %s221_s10 = sadd.s32 1, %s2348_s26 }
   0x6   : > { %p34_p0 = scmp.ge.s32.totalorder %s32_s9, 2  ;;  %p231_p1 = scmp.ne.s32.totalorder %s2348_s26, %s2344_s25 }
   0x7   : > { %p232_p2 = scmp.eq.s32.totalorder %s1753_s30, 1  ;;  %p237_p3 = scmp.ne.s32.totalorder %s2344_s25, %s2340_s24 }
   0x8   : > { %s2781_s9 = smov (%p34_p0, %s32_s9), 0  ;;  %p238_p5 = scmp.eq.s32.totalorder %s1754_s8, 1 }
   0x9   : > { %p2454_p4 = por %p232_p2, %p231_p1  ;;  %s216_s12 = ssub.s32 %s2356_s28, %s2781_s9 }
   0xa   : > { %p1757_p6 = scmp.ge.s32.totalorder %s2360_s29, 1  ;;  %p219_p7 = scmp.eq.s32.totalorder %s216_s12, 0 }
   0xb   : > { %p2461_p8 = por %p238_p5, %p237_p3  ;;  %p315_p9 = scmp.lt.s32.totalorder %s2360_s29, 3 }
   0xc   : > { %s2467_s14 = scalar_select %p219_p7, %s2348_s26, %s221_s10  }
   0xd   : > { %p316_p10 = pnand %p1757_p6, %p315_p9 }
   0xe   : > { %v504_v0 = vld [vmem:[%s2763_s4] sm:$0xff] (!%p316_p10)  ;;  %v505_v1 = vld [vmem:[%s2763_s4 + $0x8] sm:$0xff] (!%p316_p10)  ;;  %v506_v2 = vld [vmem:[%s2763_s4 + $0x10] sm:$0xff] (!%p316_p10)  ;;  %p376_p11 = scmp.lt.s32.totalorder (!%p316_p10), %s2352_s27, 1  ;;  %vm420_vm0 = vcmask (!%p316_p10), 261120   ;;  %vm613_vm1 = vcmask (!%p316_p10), 64512   ;;  %v599_v44 = vlaneseq (!%p316_p10) }
   0xf   : > { %319 = sbr.rel (%p316_p10) target bundleno = 2370 (0x942), region = 48  ;;  %v2016_v3 = vpack.c.bf16 (!%p316_p10), %v505_v1, %v504_v0  ;;  %v507_v4 = vld [vmem:[%s2763_s4 + $0x18] sm:$0xff] (!%p316_p10)  ;;  %v416_v5 = vld [vmem:[%s2762_s3] sm:$0xff] (!%p316_p10)  ;;  %v417_v6 = vld [vmem:[%s2762_s3 + $0x8] sm:$0xff] (!%p316_p10)  ;;  %s2365_s22 = smov (!%p316_p10), 112   ;;  %vm1522_vm9 = vcmask (!%p316_p10), 130048  }
  0x10   : > { %v2020_v7 = vpack.c.bf16 (!%p316_p10), %v507_v4, %v506_v2  ;;  %v2008_v8 = vpack.c.bf16 (!%p316_p10), %v417_v6, %v416_v5  ;;  %v418_v9 = vld [vmem:[%s2762_s3 + $0x10] sm:$0xff] (!%p316_p10)  ;;  %v419_v10 = vld [vmem:[%s2762_s3 + $0x18] sm:$0xff] (!%p316_p10)  ;;  %vm2512_vm2 = vmpackc.low (!%p316_p10), %vm613_vm1, %vm613_vm1  ;;  %v600_v45 = vshrl.u32 (!%p316_p10), %v599_v44, 7  ;;  %v603_v46 = vand.u32 (!%p316_p10), 127, %v599_v44  ;;  %s2366_s23 = smov (!%p316_p10), 80   ;;  %s2368_s8 = smov (!%p316_p10), 72  }
  0x11   : > { %2017 = vmatprep.subr.bf16.mxu1 (!%p316_p10), %v2016_v3  ;;  %v2012_v11 = vpack.c.bf16 (!%p316_p10), %v419_v10, %v418_v9  ;;  %s2369_s10 = smov (!%p316_p10), 8   ;;  %vm1525_vm10 = vcmask (!%p316_p10), 195584  }
  0x12   : > { %2019 = vmatpush3.bf16.msra.mxu1 (!%p316_p10), %v2016_v3  ;;  %2009 = vmatprep.subr.bf16.mxu0 (!%p316_p10), %v2008_v8  ;;  %v601_v47 = vadd.s32 (!%p316_p10), 8, %v600_v45  ;;  %v1768_v48 = vadd.s32 (!%p316_p10), 4294967288, %v603_v46 }
  0x13   : > { %2021 = vmatprep.subr.bf16.mxu1 (!%p316_p10), %v2020_v7  ;;  %2011 = vmatpush3.bf16.msra.mxu0 (!%p316_p10), %v2008_v8 }
  0x14   : > { %2013 = vmatprep.subr.bf16.mxu0 (!%p316_p10), %v2012_v11  ;;  %v606_v49 = vsub.s32 (!%p316_p10), %v1768_v48, %v601_v47  ;;  %v605_v50 = vsub.s32 (!%p316_p10), %v1768_v48, %v600_v45 }
  0x16   : > { %s377_s12 = scalar_select %p376_p11, %s2352_s27, 1  ;;  %2023 = vmatpush3.bf16.msra.mxu1 %v2020_v7  ;;  %vm608_vm3 = vcmp.ge.s32.totalorder %v606_v49, 4294967294  ;;  %vm610_vm4 = vcmp.le.s32.totalorder %v606_v49, 2  ;;  %vm607_vm5 = vcmp.ge.s32.totalorder %v605_v50, 4294967294  ;;  %vm609_vm6 = vcmp.le.s32.totalorder %v605_v50, 2 }
  0x17   : > { %2015 = vmatpush3.bf16.msra.mxu0 %v2012_v11  ;;  %vm2548_vm7 = vmand %vm608_vm3, %vm610_vm4 }
  0x18   : > { %s2119_s19 = smul.u32 48, %s377_s12  ;;  %vm2552_vm8 = vmand %vm607_vm5, %vm609_vm6 }
  0x1a   : > { %s1810_s20 = sadd.s32 8, %s2119_s19  ;;  %s1812_s21 = sadd.s32 16, %s2119_s19 }
  0x1b   : > { %s383_s30 = scalar_lea.vmem %s2759_s0, %s1810_s20  ;;  %s396_s15 = scalar_lea.vmem %s2760_s1, %s1812_s21 }
  0x1c   : > { %v414_v12 = vld [vmem:[%s383_s30] sm:$0xff]  ;;  %v413_v14 = vld [vmem:[%s396_s15 + $0x8] sm:$0xff]  ;;  %s1814_s16 = sadd.s32 32, %s2119_s19  ;;  %s2362_s19 = smov 96  }
  0x1d   : > { %v412_v13 = vld [vmem:[%s396_s15] sm:$0xff]  ;;  %1903 = vmatprep.mubr.msk.f32.mxu1 %vm420_vm0, %v414_v12  ;;  %s408_s18 = scalar_lea.vmem %s2761_s2, %s1814_s16  ;;  %s2363_s20 = smov 120  }
  0x1e   : > { %1892 = vmatprep.mubr.msk.f32.mxu0 %vm420_vm0, %v412_v13  ;;  %1904 = vmatmul.mubr.msk.f32.vlgmr.msra.gmra.mrb[0].mxu1 %vm420_vm0, %v412_v13  ;;  %v415_v15 = vld [vmem:[%s408_s18] sm:$0xff]  ;;  %s2364_s21 = smov 88   ;;  %s2367_s30 = smov 104  }
  0x1f   : > { %1906 = vmatprep.mubr.msk.f32.mxu1 %vm420_vm0, %v413_v14  ;;  %1893 = vmatmul.mubr.msk.f32.vlgmr.msra.gmra.mrb[0].mxu0 %vm420_vm0, %v413_v14  ;;  %s2370_s15 = smov 16   ;;  %s1815_s18 = sshll.u32 %s2352_s27, 8 }
  0x22   : > { %1907 = vmatmul.mubr.msk.f32.gmra.mrb[2].mxu1 %vm420_vm0, %v415_v15 }
  0xf1   : > { %v1905_v16 = vpop.f32.mrb[0].mxu1 }
  0xf2   : > { %v580_v17 = vpop.f32.mrb[1].mxu1  ;;  %v1894_v19 = vpop.f32.mrb[0].mxu0 }
  0xf3   : > { %v2516_v20 = vpack.i.bf16 %v1905_v16, %v580_v17  ;;  %v2024_v21 = vpack.c.bf16 %v1905_v16, %v580_v17  ;;  %v493_v22 = vpop.f32.mrb[1].mxu0  ;;  %v2538_v28 = vmul.f32 0.35355338, %v1894_v19 }
  0xf4   : > { %v2518_v23 = vmul.f32 0.35355338, %v493_v22 }
  0xf5   : > { %2181 = vrot.lane.b32.xlu1 %v2516_v20, %s2362_s19  ;;  %v1908_v24 = vpop.f32.mrb[2].mxu1  ;;  %2026 = vmatprep.subr.msk.bf16.mxu0 %vm2512_vm2, %v2024_v21 }
  0xf6   : > { %v590_v25 = vpop.f32.mrb[3].mxu1  ;;  %2029 = vmatpush3.bf16.xpose.msk.msra.mxu0 %vm2512_vm2, %v2024_v21  ;;  %1917 = vmatprep.mubr.msk.f32.mxu0 %vm613_vm1, %v2518_v23 }
  0xf7   : > { %v2527_v26 = vpack.i.bf16 %v1908_v24, %v590_v25  ;;  %v2030_v27 = vpack.c.bf16 %v1908_v24, %v590_v25 }
  0xf9   : > { %2186 = vrot.lane.b32.xlu1 %v2527_v26, %s2362_s19  ;;  %2032 = vmatprep.subr.msk.bf16.mxu0 %vm2512_vm2, %v2030_v27 }
  0xfd   : > { %2196 = vrot.lane.b32.xlu1 %v2527_v26, %s2363_s20 }
  0xfe   : > { %2035 = vmatpush3.bf16.xpose.msk.msra.mxu0 %vm2512_vm2, %v2030_v27 }
 0x101   : > { %830 = vrot.lane.b32.xlu1 %v2518_v23, %s2363_s20 }
 0x105   : > { %832 = vrot.lane.b32.xlu1 %v2538_v28, %s2363_s20  ;;  %1918 = vmatmul.mubr.msk.f32.vlgmr.msra.gmra.mrb[2].mxu0 %vm613_vm1, %v2538_v28 }
 0x109   : > { %2201 = vrot.lane.b32.xlu1 %v2516_v20, %s2364_s21 }
 0x10d   : > { %2211 = vrot.lane.b32.xlu1 %v2516_v20, %s2365_s22 }
 0x167   : > { %v2182_v29 = vpop.permute.xlu1 %2181 }
 0x168   : > { %v2184_v30 = vunpack.i.h.bf16 %v2182_v29  ;;  %v2183_v31 = vunpack.i.l.bf16 %v2182_v29 }
 0x16a   : > { %v2036_v32 = vpack.c.bf16 %v2184_v30, %v2183_v31 }
 0x16b   : > { %v2187_v33 = vpop.permute.xlu1 %2186 }
 0x16c   : > { %v2189_v34 = vunpack.i.h.bf16 %v2187_v33  ;;  %v2188_v35 = vunpack.i.l.bf16 %v2187_v33  ;;  %2037 = vmatprep.subr.bf16.mxu1 %v2036_v32 }
 0x16d   : > { %2039 = vmatpush3.bf16.msra.mxu1 %v2036_v32 }
 0x16e   : > { %v2040_v36 = vpack.c.bf16 %v2189_v34, %v2188_v35 }
 0x16f   : > { %v2197_v37 = vpop.permute.xlu1 %2196 }
 0x170   : > { %2041 = vmatprep.subr.bf16.mxu1 %v2040_v36  ;;  %v2199_v5 = vunpack.i.h.bf16 %v2197_v37  ;;  %v2198_v6 = vunpack.i.l.bf16 %v2197_v37 }
 0x171   : > { %2043 = vmatpush3.bf16.msra.mxu1 %v2040_v36 }
 0x172   : > { %v2050_v9 = vpack.c.bf16 %v2199_v5, %v2198_v6 }
 0x173   : > { %v831_v38 = vpop.permute.xlu1 %830 }
 0x177   : > { %v833_v39 = vpop.permute.xlu1 %832 }
 0x17b   : > { %v2202_v40 = vpop.permute.xlu1 %2201 }
 0x17c   : > { %v2204_v41 = vunpack.i.h.bf16 %v2202_v40  ;;  %v2203_v42 = vunpack.i.l.bf16 %v2202_v40 }
 0x17e   : > { %v2056_v43 = vpack.c.bf16 %v2204_v41, %v2203_v42 }
 0x17f   : > { %v2212_v19 = vpop.permute.xlu1 %2211 }
 0x180   : > { %2057 = vmatprep.subr.bf16.mxu0 %v2056_v43  ;;  %v2214_v31 = vunpack.i.h.bf16 %v2212_v19  ;;  %v2213_v32 = vunpack.i.l.bf16 %v2212_v19 }
 0x181   : > { %2059 = vmatpush3.bf16.msra.mxu0 %v2056_v43 }
 0x182   : > { %v2064_v36 = vpack.c.bf16 %v2214_v31, %v2213_v32 }
 0x1d8   : > { %v1919_v52 = vpop.f32.mrb[2].mxu0 }
 0x1d9   : > { %v708_v54 = vsel %vm2548_vm7, %v1919_v52, -1e+30  ;;  %v698_v55 = vpop.f32.mrb[3].mxu0 }
 0x1da   : > { %v712_v56 = vsel %vm420_vm0, %v708_v54, -inf  ;;  %v707_v57 = vsel %vm2552_vm8, %v698_v55, -1e+30 }
 0x1db   : > { %713 = vmax.xlane.f32.xlu0 %v712_v56  ;;  %v709_v58 = vsel %vm420_vm0, %v707_v57, -inf }
 0x1df   : > { %710 = vmax.xlane.f32.xlu0 %v709_v58 }
 0x1f5   : > { %2191 = vrot.lane.b32.xlu0 %v2516_v20, %s2363_s20 }
 0x268   : > { %v714_v59 = vpop.xlane.xlu0 %713 }
 0x269   : > { %v716_v60 = vsub.f32 %v708_v54, %v714_v59 }
 0x26b   : > { %v719_v63 = vmul.f32 1.442695, %v716_v60 }
 0x26c   : > { %v711_v61 = vpop.xlane.xlu0 %710 }
 0x26d   : > { %v715_v62 = vsub.f32 %v707_v57, %v711_v61 }
 0x26f   : > { %v717_v0 = vmul.f32 1.442695, %v715_v62 }
 0x270   : > { %v2192_v1 = vpop.permute.xlu0 %2191 }
 0x271   : > { %2250 = vpow2.f32 %v717_v0  ;;  %v2194_v2 = vunpack.i.h.bf16 %v2192_v1  ;;  %v2193_v3 = vunpack.i.l.bf16 %v2192_v1 }
 0x272   : > { %2252 = vpow2.f32 %v719_v63 }
 0x273   : > { %v2044_v4 = vpack.c.bf16 %v2194_v2, %v2193_v3 }
 0x275   : > { %2046 = vmatprep.subr.msk.bf16.mxu1 %vm2512_vm2, %v2044_v4 }
 0x27b   : > { %v2566_v7 = vpop.eup %2250 }
 0x27c   : > { %v2568_v8 = vpop.eup %2252  ;;  %1928 = vmatprep.mubr.msk.f32.mxu1 %vm420_vm0, %v2566_v7 }
 0x27d   : > { %1929 = vmatmul.mubr.msk.f32.vlgmr.msra.gmra.mrb[4].mxu1 %vm420_vm0, %v2568_v8 }
 0x27e   : > { %2049 = vmatpush3.bf16.xpose.msk.msra.mxu1 %vm2512_vm2, %v2044_v4  ;;  %1939 = vmatprep.mubr.msk.f32.mxu1 %vm613_vm1, %v831_v38 }
 0x27f   : > { %2052 = vmatprep.subr.msk.bf16.mxu1 %vm2512_vm2, %v2050_v9 }
 0x286   : > { %2055 = vmatpush3.bf16.xpose.msk.msra.mxu1 %vm2512_vm2, %v2050_v9 }
 0x28d   : > { %1940 = vmatmul.mubr.msk.f32.vlgmr.msra.gmra.mrb[6].mxu1 %vm613_vm1, %v833_v39 }
 0x350   : > { %v2582_v10 = vpop.f32.mrb[4].mxu1 }
 0x351   : > { %v2584_v11 = vpop.f32.mrb[5].mxu1 }
 0x360   : > { %v1941_v12 = vpop.f32.mrb[6].mxu1 }
 0x361   : > { %v930_v13 = vsel %vm2548_vm7, %v1941_v12, -1e+30  ;;  %v920_v14 = vpop.f32.mrb[7].mxu1 }
 0x362   : > { %v929_v15 = vsel %vm2552_vm8, %v920_v14, -1e+30  ;;  %v934_v16 = vsel %vm420_vm0, %v930_v13, -inf }
 0x363   : > { %935 = vmax.xlane.f32.xlu0 %v934_v16  ;;  %v931_v17 = vsel %vm420_vm0, %v929_v15, -inf }
 0x364   : > { %932 = vmax.xlane.f32.xlu1 %v931_v17 }
 0x375   : > { %2216 = vrot.lane.b32.xlu1 %v2527_v26, %s2365_s22 }
 0x379   : > { %2206 = vrot.lane.b32.xlu0 %v2527_v26, %s2364_s21  ;;  %1052 = vrot.lane.b32.xlu1 %v2518_v23, %s2365_s22  ;;  %s2708_s21 = scalar_lea.hbm %s2766_s7, %s1815_s18 }
 0x37d   : > { %1054 = vrot.lane.b32.xlu0 %v2538_v28, %s2365_s22  ;;  %2226 = vrot.lane.b32.xlu1 %v2527_v26, %s2366_s23 }
 0x3f0   : > { %v936_v21 = vpop.xlane.xlu0 %935 }
 0x3f1   : > { %v938_v22 = vsub.f32 %v930_v13, %v936_v21  ;;  %v933_v24 = vpop.xlane.xlu1 %932 }
 0x3f2   : > { %v937_v25 = vsub.f32 %v929_v15, %v933_v24 }
 0x3f3   : > { %v941_v27 = vmul.f32 1.442695, %v938_v22 }
 0x3f4   : > { %v939_v29 = vmul.f32 1.442695, %v937_v25  ;;  %v2207_v30 = vpop.permute.xlu0 %2206 }
 0x3f5   : > { %v2209_v33 = vunpack.i.h.bf16 %v2207_v30  ;;  %v2208_v34 = vunpack.i.l.bf16 %v2207_v30  ;;  %v2217_v37 = vpop.permute.xlu1 %2216 }
 0x3f6   : > { %2254 = vpow2.f32 %v939_v29  ;;  %v2219_v38 = vunpack.i.h.bf16 %v2217_v37  ;;  %v2218_v39 = vunpack.i.l.bf16 %v2217_v37 }
 0x3f7   : > { %2256 = vpow2.f32 %v941_v27  ;;  %v2060_v35 = vpack.c.bf16 %v2209_v33, %v2208_v34 }
 0x3f8   : > { %v2070_v42 = vpack.c.bf16 %v2219_v38, %v2218_v39  ;;  %v1055_v44 = vpop.permute.xlu0 %1054 }
 0x3f9   : > { %2061 = vmatprep.subr.bf16.mxu0 %v2060_v35  ;;  %v1053_v43 = vpop.permute.xlu1 %1052 }
 0x3fa   : > { %2063 = vmatpush3.bf16.msra.mxu0 %v2060_v35 }
 0x3fb   : > { %2066 = vmatprep.subr.msk.bf16.mxu0 %vm2512_vm2, %v2064_v36 }
 0x3fd   : > { %v2227_v55 = vpop.permute.xlu1 %2226 }
 0x3fe   : > { %v2229_v63 = vunpack.i.h.bf16 %v2227_v55  ;;  %v2228_v0 = vunpack.i.l.bf16 %v2227_v55 }
 0x400   : > { %v2604_v40 = vpop.eup %2254  ;;  %v2080_v4 = vpack.c.bf16 %v2229_v63, %v2228_v0 }
 0x401   : > { %v2606_v41 = vpop.eup %2256  ;;  %1950 = vmatprep.mubr.msk.f32.mxu0 %vm420_vm0, %v2604_v40  ;;  %v943_v51 = vsel %vm420_vm0, %v2604_v40, 0.0 }
 0x402   : > { %1951 = vmatmul.mubr.msk.f32.vlgmr.msra.gmra.mrb[4].mxu0 %vm420_vm0, %v2606_v41  ;;  %v946_v31 = vsel %vm420_vm0, %v2606_v41, 0.0 }
 0x403   : > { %2069 = vmatpush3.bf16.xpose.msk.msra.mxu0 %vm2512_vm2, %v2064_v36  ;;  %1961 = vmatprep.mubr.msk.f32.mxu0 %vm613_vm1, %v1053_v43 }
 0x404   : > { %2072 = vmatprep.subr.msk.bf16.mxu0 %vm2512_vm2, %v2070_v42 }
 0x40b   : > { %2075 = vmatpush3.bf16.xpose.msk.msra.mxu0 %vm2512_vm2, %v2070_v42 }
 0x412   : > { %1962 = vmatmul.mubr.msk.f32.vlgmr.msra.gmra.mrb[6].mxu0 %vm613_vm1, %v1055_v44 }
 0x4d5   : > { %v2620_v45 = vpop.f32.mrb[4].mxu0 }
 0x4d6   : > { %v2622_v46 = vpop.f32.mrb[5].mxu0 }
 0x4e5   : > { %v1963_v47 = vpop.f32.mrb[6].mxu0 }
 0x4e6   : > { %v1152_v48 = vsel %vm2548_vm7, %v1963_v47, -1e+30  ;;  %v1142_v49 = vpop.f32.mrb[7].mxu0 }
 0x4e7   : > { %v1151_v50 = vsel %vm2552_vm8, %v1142_v49, -1e+30  ;;  %v1156_v52 = vsel %vm420_vm0, %v1152_v48, -inf }
 0x4e8   : > { %1157 = vmax.xlane.f32.xlu0 %v1156_v52  ;;  %v1153_v54 = vsel %vm420_vm0, %v1151_v50, -inf  ;;  %v724_v52 = vsel %vm420_vm0, %v2568_v8, 0.0 }
 0x4e9   : > { %1154 = vmax.xlane.f32.xlu1 %v1153_v54  ;;  %v721_v54 = vsel %vm420_vm0, %v2566_v7, 0.0 }
 0x4fa   : > { %2231 = vrot.lane.b32.xlu1 %v2516_v20, %s2367_s30 }
 0x4fe   : > { %2221 = vrot.lane.b32.xlu0 %v2516_v20, %s2366_s23  ;;  %1274 = vrot.lane.b32.xlu1 %v2518_v23, %s2367_s30  ;;  %s2371_s23 = smov 24  }
 0x502   : > { %2236 = vrot.lane.b32.xlu0 %v2527_v26, %s2367_s30 }
 0x506   : > { %1276 = vrot.lane.b32.xlu0 %v2538_v28, %s2367_s30  ;;  %s370_s30 = sand.u32 1, %s2344_s25  }
 0x507   : > { %s2712_s22 = scalar_lea.sflag [#allocation3], %s370_s30 }
 0x575   : > { %v1158_v56 = vpop.xlane.xlu0 %1157 }
 0x576   : > { %v1160_v57 = vsub.f32 %v1152_v48, %v1158_v56  ;;  %v1155_v58 = vpop.xlane.xlu1 %1154 }
 0x577   : > { %v1159_v59 = vsub.f32 %v1151_v50, %v1155_v58 }
 0x578   : > { %v1163_v60 = vmul.f32 1.442695, %v1160_v57 }
 0x579   : > { %v1161_v61 = vmul.f32 1.442695, %v1159_v59  ;;  %v2222_v62 = vpop.permute.xlu0 %2221 }
 0x57a   : > { %v2224_v1 = vunpack.i.h.bf16 %v2222_v62  ;;  %v2223_v2 = vunpack.i.l.bf16 %v2222_v62  ;;  %v2232_v3 = vpop.permute.xlu1 %2231 }
 0x57b   : > { %2258 = vpow2.f32 %v1161_v61  ;;  %v2234_v5 = vunpack.i.h.bf16 %v2232_v3  ;;  %v2233_v6 = vunpack.i.l.bf16 %v2232_v3 }
 0x57c   : > { %2260 = vpow2.f32 %v1163_v60  ;;  %v2076_v23 = vpack.c.bf16 %v2224_v1, %v2223_v2 }
 0x57d   : > { %v2084_v28 = vpack.c.bf16 %v2234_v5, %v2233_v6  ;;  %v2237_v9 = vpop.permute.xlu0 %2236 }
 0x57e   : > { %2077 = vmatprep.subr.bf16.mxu1 %v2076_v23  ;;  %v2239_v14 = vunpack.i.h.bf16 %v2237_v9  ;;  %v2238_v15 = vunpack.i.l.bf16 %v2237_v9  ;;  %v1275_v16 = vpop.permute.xlu1 %1274 }
 0x57f   : > { %2079 = vmatpush3.bf16.msra.mxu1 %v2076_v23 }
 0x580   : > { %2081 = vmatprep.subr.bf16.mxu1 %v2080_v4  ;;  %v2090_v17 = vpack.c.bf16 %v2239_v14, %v2238_v15  ;;  %v1530_v15 = vld [vmem:[%s2764_s5 + $0x10] sm:$0xff] }
 0x581   : > { %v1277_v19 = vpop.permute.xlu0 %1276 }
 0x583   : > { %2083 = vmatpush3.bf16.msra.mxu1 %v2080_v4 }
 0x584   : > { %2086 = vmatprep.subr.msk.bf16.mxu1 %vm2512_vm2, %v2084_v28 }
 0x585   : > { %v2259_v12 = vpop.eup %2258 }
 0x586   : > { %v2261_v13 = vpop.eup %2260  ;;  %1972 = vmatprep.mubr.msk.f32.mxu1 %vm420_vm0, %v2259_v12  ;;  %v1165_v53 = vsel %vm420_vm0, %v2259_v12, 0.0 }
 0x587   : > { %1973 = vmatmul.mubr.msk.f32.vlgmr.msra.gmra.mrb[8].mxu1 %vm420_vm0, %v2261_v13  ;;  %v1168_v32 = vsel %vm420_vm0, %v2261_v13, 0.0 }
 0x588   : > { %1983 = vmatprep.mubr.msk.f32.mxu1 %vm613_vm1, %v1275_v16 }
 0x58c   : > { %2089 = vmatpush3.bf16.xpose.msk.msra.mxu1 %vm2512_vm2, %v2084_v28 }
 0x58d   : > { %2092 = vmatprep.subr.msk.bf16.mxu1 %vm2512_vm2, %v2090_v17 }
 0x594   : > { %2095 = vmatpush3.bf16.xpose.msk.msra.mxu1 %vm2512_vm2, %v2090_v17  ;;  %v1531_v17 = vld [vmem:[%s2764_s5 + $0x18] sm:$0xff] }
 0x59b   : > { %1984 = vmatmul.mubr.msk.f32.vlgmr.msra.gmra.mrb[10].mxu1 %vm613_vm1, %v1277_v19  ;;  %v2108_v19 = vpack.c.bf16 %v1531_v17, %v1530_v15 }
 0x65a   : > { %v2648_v21 = vpop.f32.mrb[8].mxu1 }
 0x65b   : > { %v2650_v22 = vpop.f32.mrb[9].mxu1 }
 0x66e   : > { %v1985_v24 = vpop.f32.mrb[10].mxu1 }
 0x66f   : > { %v1374_v25 = vsel %vm2548_vm7, %v1985_v24, -1e+30  ;;  %v1364_v27 = vpop.f32.mrb[11].mxu1 }
 0x670   : > { %v1373_v29 = vsel %vm2552_vm8, %v1364_v27, -1e+30  ;;  %v1378_v30 = vsel %vm420_vm0, %v1374_v25, -inf }
 0x671   : > { %1379 = vmax.xlane.f32.xlu0 %v1378_v30  ;;  %v1375_v18 = vsel %vm420_vm0, %v1373_v29, -inf }
 0x672   : > { %1376 = vmax.xlane.f32.xlu1 %v1375_v18 }
 0x683   : > { %2246 = vrot.lane.b32.xlu1 %v2527_v26, %s2368_s8 }
 0x687   : > { %2241 = vrot.lane.b32.xlu0 %v2516_v20, %s2368_s8  ;;  %s1758_s8 = sshll.u32 %s370_s30, 4 }
 0x688   : > { %s372_s12 = scalar_lea.vmem [#allocation2], %s1758_s8 }
 0x689   : > { %s1638_s17 = sshll.u32 %s372_s12, 4  ;;  %s2703_s17 = int_to_ptr.vmem [resolvable:$true] %s1638_s17 }
 0x68a   : > { %s2282_s27 = scalar_lea.vmem %s2703_s17, 256 }
 0x68b   : > { %p2283_p12 = scmp.ne.s32.totalorder %s2703_s17, %s2282_s27 }
 0x68d   : > { %p2284_p13 = pnand %p2283_p12, %p2454_p4 }
 0x68f   : > { %p2285_p0 = pneg %p2284_p13 }
 0x6a6   : > { %947 = vadd.xlane.f32.xlu0 %v946_v31 }
 0x6a7   : > { %944 = vadd.xlane.f32.xlu1 %v943_v51 }
 0x6aa   : > { %1166 = vadd.xlane.f32.xlu0 %v1165_v53 }
 0x6ab   : > { %1169 = vadd.xlane.f32.xlu1 %v1168_v32 }
 0x6fe   : > { %v1380_v33 = vpop.xlane.xlu0 %1379 }
 0x6ff   : > { %v1382_v34 = vsub.f32 %v1374_v25, %v1380_v33  ;;  %v1377_v35 = vpop.xlane.xlu1 %1376 }
 0x700   : > { %v1381_v26 = vsub.f32 %v1373_v29, %v1377_v35 }
 0x701   : > { %v1385_v36 = vmul.f32 1.442695, %v1382_v34 }
 0x702   : > { %v1383_v20 = vmul.f32 1.442695, %v1381_v26  ;;  %v2242_v37 = vpop.permute.xlu0 %2241 }
 0x703   : > { %2262 = vpow2.f32 %v1385_v36  ;;  %v2244_v38 = vunpack.i.h.bf16 %v2242_v37  ;;  %v2243_v39 = vunpack.i.l.bf16 %v2242_v37  ;;  %v2247_v41 = vpop.permute.xlu1 %2246 }
 0x704   : > { %2264 = vpow2.f32 %v1383_v20  ;;  %v2249_v40 = vunpack.i.h.bf16 %v2247_v41  ;;  %v2248_v42 = vunpack.i.l.bf16 %v2247_v41 }
 0x705   : > { %v2096_v43 = vpack.c.bf16 %v2244_v38, %v2243_v39 }
 0x706   : > { %v2100_v44 = vpack.c.bf16 %v2249_v40, %v2248_v42 }
 0x707   : > { %2097 = vmatprep.subr.bf16.mxu0 %v2096_v43 }
 0x708   : > { %2099 = vmatpush3.bf16.msra.mxu0 %v2096_v43 }
 0x709   : > { %2101 = vmatprep.subr.bf16.mxu0 %v2100_v44 }
 0x70c   : > { %2103 = vmatpush3.bf16.msra.mxu0 %v2100_v44 }
 0x70d   : > { %v2263_v47 = vpop.eup %2262 }
 0x70e   : > { %v2265_v48 = vpop.eup %2264  ;;  %v1390_v49 = vsel %vm420_vm0, %v2263_v47, 0.0 }
 0x70f   : > { %1391 = vadd.xlane.f32.xlu1 %v1390_v49  ;;  %1994 = vmatprep.mubr.msk.f32.mxu0 %vm420_vm0, %v2265_v48  ;;  %v1387_v50 = vsel %vm420_vm0, %v2265_v48, 0.0 }
 0x710   : > { %1388 = vadd.xlane.f32.xlu0 %v1387_v50  ;;  %1995 = vmatmul.mubr.msk.f32.vlgmr.msra.gmra.mrb[8].mxu0 %vm420_vm0, %v2263_v47 }
 0x713   : > { %725 = vadd.xlane.f32.xlu1 %v724_v52 }
 0x714   : > { %722 = vadd.xlane.f32.xlu0 %v721_v54 }
 0x733   : > { %v948_v55 = vpop.xlane.xlu0 %947 }
 0x734   : > { %2266 = vrcp.f32 %v948_v55  ;;  %v945_v56 = vpop.xlane.xlu1 %944 }
 0x735   : > { %2268 = vrcp.f32 %v945_v56 }
 0x737   : > { %v1167_v57 = vpop.xlane.xlu0 %1166 }
 0x738   : > { %2270 = vrcp.f32 %v1167_v57  ;;  %v1170_v58 = vpop.xlane.xlu1 %1169 }
 0x739   : > { %2272 = vrcp.f32 %v1170_v58 }
 0x73e   : > { %v2267_v59 = vpop.eup %2266 }
 0x73f   : > { %v2269_v60 = vpop.eup %2268  ;;  %v952_v61 = vmul.f32 %v2267_v59, %v948_v55 }
 0x740   : > { %v951_v62 = vmul.f32 %v2269_v60, %v945_v56 }
 0x741   : > { %v954_v63 = vsub.f32 2.0, %v952_v61 }
 0x742   : > { %v2271_v0 = vpop.eup %2270  ;;  %v953_v8 = vsub.f32 2.0, %v951_v62 }
 0x743   : > { %v2273_v1 = vpop.eup %2272  ;;  %v956_v2 = vmul.f32 %v2267_v59, %v954_v63  ;;  %v1173_v3 = vmul.f32 %v2271_v0, %v1167_v57 }
 0x744   : > { %v955_v7 = vmul.f32 %v2269_v60, %v953_v8  ;;  %v1174_v23 = vmul.f32 %v2273_v1, %v1170_v58 }
 0x745   : > { %v1175_v4 = vsub.f32 2.0, %v1173_v3  ;;  %v1051_v5 = vmul.f32 %v2620_v45, %v956_v2  ;;  %v1528_v45 = vld [vmem:[%s2764_s5] sm:$0xff] }
 0x746   : > { %v1176_v6 = vsub.f32 2.0, %v1174_v23  ;;  %v1050_v28 = vmul.f32 %v2622_v46, %v955_v7  ;;  %v1529_v46 = vld [vmem:[%s2764_s5 + $0x8] sm:$0xff] }
 0x747   : > { %v1177_v9 = vmul.f32 %v2271_v0, %v1175_v4  ;;  %1500 = vrot.lane.b32.xlu1 %v1051_v5, %s2369_s10  ;;  %v2104_v16 = vpack.c.bf16 %v1529_v46, %v1528_v45 }
 0x748   : > { %v1178_v12 = vmul.f32 %v2273_v1, %v1176_v6  ;;  %1498 = vrot.lane.b32.xlu0 %v1050_v28, %s2369_s10 }
 0x749   : > { %v1272_v13 = vmul.f32 %v2650_v22, %v1177_v9  ;;  %2105 = vmatprep.subr.bf16.mxu0 %v2104_v16 }
 0x74a   : > { %v1273_v14 = vmul.f32 %v2648_v21, %v1178_v12  ;;  %2107 = vmatpush3.bf16.msra.mxu0 %v2104_v16 }
 0x74b   : > { %1506 = vrot.lane.b32.xlu1 %v1272_v13, %s2370_s15  ;;  %2109 = vmatprep.subr.bf16.mxu0 %v2108_v19 }
 0x74c   : > { %1508 = vrot.lane.b32.xlu0 %v1273_v14, %s2370_s15 }
 0x74e   : > { %2111 = vmatpush3.bf16.msra.mxu0 %v2108_v19 }
 0x79c   : > { %v1392_v21 = vpop.xlane.xlu1 %1391 }
 0x79d   : > { %v1389_v22 = vpop.xlane.xlu0 %1388  ;;  %2274 = vrcp.f32 %v1392_v21 }
 0x79e   : > { %2276 = vrcp.f32 %v1389_v22 }
 0x7a0   : > { %v726_v26 = vpop.xlane.xlu1 %725 }
 0x7a1   : > { %v723_v35 = vpop.xlane.xlu0 %722 }
 0x7a2   : > { %2278 = vrcp.f32 %v723_v35 }
 0x7a3   : > { %2280 = vrcp.f32 %v726_v26 }
 0x7a7   : > { %v2275_v24 = vpop.eup %2274 }
 0x7a8   : > { %v2277_v25 = vpop.eup %2276  ;;  %v1396_v27 = vmul.f32 %v2275_v24, %v1392_v21 }
 0x7a9   : > { %v1395_v29 = vmul.f32 %v2277_v25, %v1389_v22 }
 0x7aa   : > { %v1398_v30 = vsub.f32 2.0, %v1396_v27 }
 0x7ab   : > { %v1397_v18 = vsub.f32 2.0, %v1395_v29 }
 0x7ac   : > { %v1400_v31 = vmul.f32 %v2275_v24, %v1398_v30  ;;  %v2279_v36 = vpop.eup %2278 }
 0x7ad   : > { %v1399_v53 = vmul.f32 %v2277_v25, %v1397_v18  ;;  %v2281_v20 = vpop.eup %2280  ;;  %v729_v37 = vmul.f32 %v2279_v36, %v723_v35 }
 0x7ae   : > { %v730_v38 = vmul.f32 %v2281_v20, %v726_v26 }
 0x7af   : > { %v731_v39 = vsub.f32 2.0, %v729_v37 }
 0x7b0   : > { %v732_v40 = vsub.f32 2.0, %v730_v38 }
 0x7b1   : > { %v733_v43 = vmul.f32 %v2279_v36, %v731_v39 }
 0x7b2   : > { %v734_v44 = vmul.f32 %v2281_v20, %v732_v40 }
 0x7b3   : > { %v828_v49 = vmul.f32 %v2584_v11, %v733_v43 }
 0x7b4   : > { %v829_v50 = vmul.f32 %v2582_v10, %v734_v44  ;;  %v1801_v10 = vld [vmem:[%s2765_s6] ss:$0 sm:$0xff] }
 0x7b9   : > { %v1501_v42 = vpop.permute.xlu1 %1500 }
 0x7ba   : > { %v1499_v41 = vpop.permute.xlu0 %1498  ;;  %v1521_v55 = vsel %vm613_vm1, %v829_v50, %v1501_v42 }
 0x7bb   : > { %v1520_v52 = vsel %vm613_vm1, %v828_v49, %v1499_v41 }
 0x7bd   : > { %v1507_v48 = vpop.permute.xlu1 %1506 }
 0x7be   : > { %v1509_v47 = vpop.permute.xlu0 %1508  ;;  %v1523_v56 = vsel %vm1522_vm9, %v1520_v52, %v1507_v48 }
 0x7bf   : > { %v1524_v58 = vsel %vm1522_vm9, %v1521_v55, %v1509_v47 }
 0x7e3   : > { %v1996_v51 = vpop.f32.mrb[8].mxu0 }
 0x7e4   : > { %v1495_v32 = vmul.f32 %v1996_v51, %v1400_v31  ;;  %v1485_v33 = vpop.f32.mrb[9].mxu0 }
 0x7e5   : > { %v1494_v34 = vmul.f32 %v1485_v33, %v1399_v53 }
 0x7e6   : > { %1516 = vrot.lane.b32.xlu0 %v1495_v32, %s2371_s23 }
 0x7e7   : > { %1514 = vrot.lane.b32.xlu1 %v1494_v34, %s2371_s23  ;;  %s2372_s23 = smov [#allocation2]  }
 0x7e8   : > { %s2286_s8 = sshll.u32 %s2372_s23, 4  ;;  %s2287_s8 = int_to_ptr.vmem [resolvable:$false] %s2286_s8 }
 0x7e9   : > { %s2288_s15 = scalar_lea.vmem %s2287_s8, 512  ;;  %p2289_p1 = scmp.lt.s32.totalorder %s2703_s17, %s2287_s8 }
 0x7ea   : > { %p2290_p2 = scmp.lt.s32.totalorder %s2288_s15, %s2282_s27 }
 0x7ec   : > { %p2291_p3 = por %p2290_p2, %p2289_p1 }
 0x7ee   : > { %p2292_p5 = pnand %p2291_p3, %p2285_p0 }
 0x858   : > { %v1517_v54 = vpop.permute.xlu0 %1516 }
 0x859   : > { %v1515_v57 = vpop.permute.xlu1 %1514  ;;  %v1527_v60 = vsel %vm1525_vm10, %v1524_v58, %v1517_v54 }
 0x85a   : > { %v1526_v59 = vsel %vm1525_vm10, %v1523_v56, %v1515_v57 }
 0x85b   : > { %2005 = vmatprep.mubr.msk.f32.mxu0 %vm420_vm0, %v1526_v59 }
 0x85c   : > { %2006 = vmatmul.mubr.msk.f32.vlgmr.msra.gmra.mrb[10].mxu0 %vm420_vm0, %v1527_v60 }
 0x92f   : > { %v2007_v11 = vpop.f32.mrb[10].mxu0 }
 0x930   : > { %v1617_v61 = vadd.f32 %v2007_v11, %v1801_v10  ;;  %v1611_v62 = vpop.f32.mrb[11].mxu0 }
 0x931   : > { %v1612_v63 = vadd.f32 %v1801_v10, %v1611_v62 }
 0x932   : > { %1621 = vst.msk [vmem:[%s372_s12 + $0x8] sm:$0xff] %vm420_vm0, %v1617_v61 }
 0x933   : > { %1620 = vst.msk [vmem:[%s372_s12] sm:$0xff] %vm420_vm0, %v1612_v63 }
 0x934   : > { %2295 = shalt.err (!%p2292_p5)
}
 0x935   : > { %s2296_s30 = scalar_lea.hbm %s2708_s21, 256  ;;  %s2300_s18 = scalar_lea.hbm %s2766_s7, 512 }
 0x936   : > { %p2297_p6 = scmp.ne.s32.totalorder %s2708_s21, %s2296_s30  ;;  %p2301_p10 = scmp.lt.u32.totalorder %s2708_s21, %s2766_s7 }
 0x937   : > { %p2302_p11 = scmp.lt.u32.totalorder %s2300_s18, %s2296_s30  ;;  %p2304_p13 = scmp.lt.u32.totalorder %s2296_s30, %s2708_s21 }
 0x938   : > { %p2298_p7 = pnand %p2297_p6, %p2454_p4 }
 0x939   : > { %p2303_p12 = por %p2302_p11, %p2301_p10 }
 0x93a   : > { %p2299_p9 = pneg %p2298_p7 }
 0x93b   : > { %p2305_p0 = por %p2304_p13, %p2303_p12 }
 0x93d   : > { %p2306_p1 = pnand %p2305_p0, %p2299_p9 }
 0x93f   : > { %2309 = shalt.err (!%p2306_p1)
}
 0x940   : > { %s2373_s27 = smov 128  }
 0x941   : > { %2113 = dma.vmem_to_hbm [thread:$0]  (%p2454_p4), %s2703_s17, 256, %s2708_s21, %s2712_s22, %s2373_s27, %s2373_s27, %s2369_s10  }
 0x942 PF: > { %p2120_p2 = scmp.ge.s32.totalorder %s2360_s29, 2  ;;  %s1653_s23 = sand.u32 1, %s2340_s24  }
 0x943   : > { %s1654_s8 = scalar_lea.sflag [#allocation3], %s1653_s23 }
 0x944   : > { %p2116_p3 = pnand %p2120_p2, %p2461_p8 }
 0x946   : > { %2335 = dma.done.wait (!%p2116_p3), %s1654_s8, 256  }
 0x947   : > { %2337 = vsyncadd (!%p2116_p3), %s1654_s8, 4294967040  ;;  %s20_s29 = sadd.s32 1, %s2360_s29   ;;  %s2775_s24 = smov %s2344_s25 }
 0x948   : > { %p17_p5 = scmp.ge.s32.totalorder %s20_s29, 4   ;;  %s2776_s25 = smov %s2348_s26 }
 0x949   : > { %s2777_s26 = smov %s2467_s14  ;;  %s2778_s27 = smov %s2356_s28 }
 0x94a   : > { %s2779_s28 = smov %s2781_s9  ;;  %19 = sbr.rel (!%p17_p5) target bundleno = 4 (0x4), region = 89 }
 0x951   :  { %1659 = vsyncpa [#allocation3], 1 }
 0x952   :  { %1661 = vsyncpa [#allocation3 + $0x1], 1 }

</bundles_post_ra>
